<compile_context>
chip_gen: v7x
topology: tpu7x:2x2x1
jax: 0.10.0
libtpu: 0.0.40
codegen_flags: <defaults>
</compile_context>

<pallas_src>
import functools

import jax
import jax.numpy as jnp
from jax.experimental import pallas as pl
from jax.experimental.pallas import tpu as pltpu


HIDDEN = 2048
DROP_P = 0.05


def _round_up(v, m):
    return (v + m - 1) // m * m


def _vmem_budget_bytes():
    # Generation-aware VMEM budget; conservative fallback = v7x per-TC capacity.
    try:
        cap = pltpu.get_tpu_info().vmem_capacity_bytes
    except Exception:
        cap = 64 * 1024 * 1024
    return int(cap) * 3 // 4


def _vmem_estimate(tm, k_pad, e_pad):
    weights = (k_pad * HIDDEN + HIDDEN * e_pad) * 2      # bf16, single-buffered
    biases = (HIDDEN + e_pad) * 4
    x_tile = 2 * tm * k_pad * 2                          # bf16, double-buffered
    o_tile = 2 * tm * e_pad * 4                          # f32 out, double-buffered
    u_tile = 2 * tm * e_pad * 4                          # dropout randoms (training)
    h_tmp = tm * HIDDEN * (4 + 2)                        # f32 h + bf16 recast
    return weights + biases + x_tile + o_tile + u_tile + h_tmp + (2 << 20)


def _choose_tm(m, k_pad, e_pad, budget):
    # >=2 row tiles when possible (v7x megacore), 8-sublane aligned, <=1024,
    # shrunk if the VMEM estimate exceeds the budget.
    tm = max(8, min(1024, _round_up((m + 1) // 2, 8)))
    while tm > 8 and _vmem_estimate(tm, k_pad, e_pad) > budget:
        tm = max(8, _round_up(tm // 2, 8))
    return tm


def _ffn_kernel(x_ref, w1_ref, b1_ref, w2_ref, b2_ref, *rest, training: bool):
    # x_ref: (TM, Kp) bf16, w1_ref: (Kp, 2048) bf16, b1_ref: (1, 2048) f32
    # w2_ref: (2048, Ep) bf16, b2_ref: (1, Ep) f32
    # training: u_ref (TM, Ep) f32 uniforms, o_ref (TM, Ep) f32
    if training:
        u_ref, o_ref = rest
    else:
        (o_ref,) = rest

    h = jnp.dot(x_ref[...], w1_ref[...], preferred_element_type=jnp.float32)
    h = jnp.maximum(h + b1_ref[...], 0.0)                       # bias + ReLU in f32

    y = jnp.dot(h.astype(jnp.bfloat16), w2_ref[...],
                preferred_element_type=jnp.float32)
    y = y + b2_ref[...]

    if training:
        # Inverted dropout, p=0.05, with wrapper-supplied uniforms.
        # TODO(synk): switch to in-kernel pltpu.prng_random_bits once an
        # interpret/CPU lowering exists, to avoid streaming the mask from HBM.
        keep_p = 1.0 - DROP_P
        y = jnp.where(u_ref[...] < keep_p, y * (1.0 / keep_p), 0.0)

    o_ref[...] = y.astype(o_ref.dtype)


def feed_forward(x, w1, b1, w2, b2, *, training=False, seed=0):
    """x: (B, N, in_channels) f32 -> (B, N, emb_dim) f32.

    Weights are stored transposed w.r.t. PyTorch nn.Linear:
      w1: (in_channels, 2048), w2: (2048, emb_dim).
    """
    B, N, K = x.shape
    E = w2.shape[1]
    M = B * N

    # Lane-dense / MXU-friendly padding.
    K_pad = _round_up(K, 128)
    E_pad = _round_up(E, 128)
    budget = _vmem_budget_bytes()
    TM = _choose_tm(M, K_pad, E_pad, budget)
    M_pad = _round_up(M, TM)

    # x shipped as bf16; pad only when needed (cast fused into the pad).
    x2 = x.reshape(M, K).astype(jnp.bfloat16)
    if M_pad != M or K_pad != K:
        x2 = jnp.pad(x2, ((0, M_pad - M), (0, K_pad - K)))

    w1_p = w1.astype(jnp.bfloat16)
    if K_pad != K:
        w1_p = jnp.pad(w1_p, ((0, K_pad - K), (0, 0)))
    w2_p = w2.astype(jnp.bfloat16)
    if E_pad != E:
        w2_p = jnp.pad(w2_p, ((0, 0), (0, E_pad - E)))
    b1_2 = b1.reshape(1, HIDDEN).astype(jnp.float32)
    b2_2 = b2.reshape(1, E).astype(jnp.float32)
    if E_pad != E:
        b2_2 = jnp.pad(b2_2, ((0, 0), (0, E_pad - E)))

    grid = (M_pad // TM,)
    resident = pl.Buffered(1)   # constant index_map -> never re-DMA'd, 1 buffer

    in_specs = [
        pl.BlockSpec((TM, K_pad), lambda i: (i, 0)),                              # x tile
        pl.BlockSpec((K_pad, HIDDEN), lambda i: (0, 0), pipeline_mode=resident),  # W1
        pl.BlockSpec((1, HIDDEN), lambda i: (0, 0), pipeline_mode=resident),      # b1
        pl.BlockSpec((HIDDEN, E_pad), lambda i: (0, 0), pipeline_mode=resident),  # W2
        pl.BlockSpec((1, E_pad), lambda i: (0, 0), pipeline_mode=resident),       # b2
    ]
    operands = [x2, w1_p, b1_2, w2_p, b2_2]

    if training:
        u = jax.random.uniform(jax.random.PRNGKey(seed), (M_pad, E_pad),
                               jnp.float32)
        in_specs.append(pl.BlockSpec((TM, E_pad), lambda i: (i, 0)))
        operands.append(u)

    kernel = functools.partial(_ffn_kernel, training=training)

    flops = 2 * M_pad * HIDDEN * (K_pad + E_pad)
    bytes_accessed = (sum(int(a.size) * a.dtype.itemsize for a in operands)
                      + M_pad * E_pad * 4)

    out = pl.pallas_call(
        kernel,
        out_shape=jax.ShapeDtypeStruct((M_pad, E_pad), jnp.float32),
        grid=grid,
        in_specs=in_specs,
        out_specs=pl.BlockSpec((TM, E_pad), lambda i: (i, 0)),
        compiler_params=pltpu.CompilerParams(
            dimension_semantics=("parallel",),   # row tiles -> both TCs on v7x
            vmem_limit_bytes=budget,
        ),
        cost_estimate=pl.CostEstimate(
            flops=flops, transcendentals=0, bytes_accessed=bytes_accessed),
    )(*operands)

    if M_pad != M or E_pad != E:
        out = out[:M, :E]
    return out.reshape(B, N, E)


def init_params(key, in_channels, emb_dim):
    # Xavier-normal weights, zero biases (matches the module's intended init).
    k1, k2 = jax.random.split(key)
    std1 = (2.0 / (in_channels + HIDDEN)) ** 0.5
    std2 = (2.0 / (HIDDEN + emb_dim)) ** 0.5
    w1 = std1 * jax.random.normal(k1, (in_channels, HIDDEN), jnp.float32)
    w2 = std2 * jax.random.normal(k2, (HIDDEN, emb_dim), jnp.float32)
    b1 = jnp.zeros((HIDDEN,), jnp.float32)
    b2 = jnp.zeros((emb_dim,), jnp.float32)
    return w1, b1, w2, b2


if __name__ == "__main__":
    key = jax.random.PRNGKey(0)
    kx, kp = jax.random.split(key)

    B, N, in_channels, emb_dim = 2, 8, 32, 32
    x = jax.random.normal(kx, (B, N, in_channels), jnp.float32)
    w1, b1, w2, b2 = init_params(kp, in_channels, emb_dim)

    # Eval-mode forward (dropout is identity).
    y = feed_forward(x, w1, b1, w2, b2, training=False)
    jax.block_until_ready(y)

    # Reference with matching bf16-operand / f32-accumulate matmul semantics.
    xb = x.reshape(-1, in_channels).astype(jnp.bfloat16)
    h_ref = jnp.maximum(
        jnp.dot(xb, w1.astype(jnp.bfloat16),
                preferred_element_type=jnp.float32) + b1, 0.0)
    y_ref = (jnp.dot(h_ref.astype(jnp.bfloat16), w2.astype(jnp.bfloat16),
                     preferred_element_type=jnp.float32) + b2)
    y_ref = y_ref.reshape(B, N, emb_dim)
    assert jnp.allclose(y, y_ref, atol=1e-2, rtol=1e-2), (
        float(jnp.max(jnp.abs(y - y_ref))))

    # Training-mode forward: exercise the dropout path once.
    y_tr = feed_forward(x, w1, b1, w2, b2, training=True, seed=1234)
    jax.block_until_ready(y_tr)
    assert bool(jnp.all(jnp.isfinite(y_tr)))
    drop_frac = float(jnp.mean((y_tr == 0.0).astype(jnp.float32)))
    assert 0.0 <= drop_frac <= 0.2, drop_frac   # ~5% expected

    print("KERNEL_OK")
</pallas_src>

<mosaic_0001>
module attributes {stable_mosaic.version = 11 : i64} {
  func.func @_ffn_kernel(%arg0: i32, %arg1: memref<8x128xbf16, #tpu.memory_space<vmem>>, %arg2: memref<128x2048xbf16, #tpu.memory_space<vmem>>, %arg3: memref<1x2048xf32, #tpu.memory_space<vmem>>, %arg4: memref<2048x128xbf16, #tpu.memory_space<vmem>>, %arg5: memref<1x128xf32, #tpu.memory_space<vmem>>, %arg6: memref<8x128xf32, #tpu.memory_space<vmem>>) attributes {dimension_semantics = [#tpu.dimension_semantics<parallel>], iteration_bounds = array<i64: 2>, scalar_prefetch = 0 : i64, scratch_operands = 0 : i64, tpu.core_type = #tpu.core_type<tc>, window_params = [{transform_indices = @transform_0, window_bounds = array<i64: 8, 128>}, {pipeline_mode = #tpu.pipeline_mode<synchronous>, transform_indices = @transform_1, window_bounds = array<i64: 128, 2048>}, {pipeline_mode = #tpu.pipeline_mode<synchronous>, transform_indices = @transform_2, window_bounds = array<i64: 1, 2048>}, {pipeline_mode = #tpu.pipeline_mode<synchronous>, transform_indices = @transform_3, window_bounds = array<i64: 2048, 128>}, {pipeline_mode = #tpu.pipeline_mode<synchronous>, transform_indices = @transform_4, window_bounds = array<i64: 1, 128>}, {transform_indices = @transform_5, window_bounds = array<i64: 8, 128>}]} {
    %c0 = arith.constant 0 : index
    %c0_0 = arith.constant 0 : index
    %0 = vector.load %arg1[%c0, %c0_0] : memref<8x128xbf16, #tpu.memory_space<vmem>>, vector<8x128xbf16>
    %c0_1 = arith.constant 0 : index
    %c0_2 = arith.constant 0 : index
    %1 = vector.load %arg2[%c0_1, %c0_2] : memref<128x2048xbf16, #tpu.memory_space<vmem>>, vector<128x2048xbf16>
    %cst = arith.constant dense<0.000000e+00> : vector<8x2048xf32>
    %2 = tpu.matmul %0, %1, %cst {dimension_numbers = #tpu.dot_dimension_numbers<[1], [0], [0], [1], [0, 0, 1, 1], [], []>} : vector<8x128xbf16>, vector<128x2048xbf16>, vector<8x2048xf32> -> vector<8x2048xf32>
    %c0_3 = arith.constant 0 : index
    %c0_4 = arith.constant 0 : index
    %3 = vector.load %arg3[%c0_3, %c0_4] : memref<1x2048xf32, #tpu.memory_space<vmem>>, vector<1x2048xf32>
    %4 = vector.broadcast %3 : vector<1x2048xf32> to vector<8x2048xf32>
    %5 = arith.addf %2, %4 : vector<8x2048xf32>
    %cst_5 = arith.constant 0.000000e+00 : f32
    %6 = vector.broadcast %cst_5 : f32 to vector<8x2048xf32>
    %7 = arith.maximumf %5, %6 : vector<8x2048xf32>
    %8 = arith.truncf %7 : vector<8x2048xf32> to vector<8x2048xbf16>
    %c0_6 = arith.constant 0 : index
    %c0_7 = arith.constant 0 : index
    %9 = vector.load %arg4[%c0_6, %c0_7] : memref<2048x128xbf16, #tpu.memory_space<vmem>>, vector<2048x128xbf16>
    %cst_8 = arith.constant dense<0.000000e+00> : vector<8x128xf32>
    %10 = tpu.matmul %8, %9, %cst_8 {dimension_numbers = #tpu.dot_dimension_numbers<[1], [0], [0], [1], [0, 0, 1, 1], [], []>} : vector<8x2048xbf16>, vector<2048x128xbf16>, vector<8x128xf32> -> vector<8x128xf32>
    %c0_9 = arith.constant 0 : index
    %c0_10 = arith.constant 0 : index
    %11 = vector.load %arg5[%c0_9, %c0_10] : memref<1x128xf32, #tpu.memory_space<vmem>>, vector<1x128xf32>
    %12 = vector.broadcast %11 : vector<1x128xf32> to vector<8x128xf32>
    %13 = arith.addf %10, %12 : vector<8x128xf32>
    %c0_11 = arith.constant 0 : index
    %c0_12 = arith.constant 0 : index
    %14 = vector.load %arg6[%c0_11, %c0_12] : memref<8x128xf32, #tpu.memory_space<vmem>>, vector<8x128xf32>
    tpu.vector_store %arg6[%c0_11, %c0_12], %13 {strides = array<i32>} : memref<8x128xf32, #tpu.memory_space<vmem>>, vector<8x128xf32>,
    return
  }
  func.func @transform_0(%arg0: i32) -> (i32, i32) {
    %c0_i32 = arith.constant 0 : i32
    %c0_i32_0 = arith.constant 0 : i32
    return %arg0, %c0_i32 : i32, i32
  }
  func.func @transform_1(%arg0: i32) -> (i32, i32) {
    %c0_i32 = arith.constant 0 : i32
    %c0_i32_0 = arith.constant 0 : i32
    %c0_i32_1 = arith.constant 0 : i32
    return %c0_i32, %c0_i32_0 : i32, i32
  }
  func.func @transform_2(%arg0: i32) -> (i32, i32) {
    %c0_i32 = arith.constant 0 : i32
    %c0_i32_0 = arith.constant 0 : i32
    %c0_i32_1 = arith.constant 0 : i32
    return %c0_i32, %c0_i32_0 : i32, i32
  }
  func.func @transform_3(%arg0: i32) -> (i32, i32) {
    %c0_i32 = arith.constant 0 : i32
    %c0_i32_0 = arith.constant 0 : i32
    %c0_i32_1 = arith.constant 0 : i32
    return %c0_i32, %c0_i32_0 : i32, i32
  }
  func.func @transform_4(%arg0: i32) -> (i32, i32) {
    %c0_i32 = arith.constant 0 : i32
    %c0_i32_0 = arith.constant 0 : i32
    %c0_i32_1 = arith.constant 0 : i32
    return %c0_i32, %c0_i32_0 : i32, i32
  }
  func.func @transform_5(%arg0: i32) -> (i32, i32) {
    %c0_i32 = arith.constant 0 : i32
    %c0_i32_0 = arith.constant 0 : i32
    return %arg0, %c0_i32 : i32, i32
  }
}

</mosaic_0001>

<bundles_post_ra>
// kernel: tpu_custom_call.1
= control target key start
LH: loop header
LB: loop body
LE: loop exit
PB: predicated region body
PF: predicated region fallthrough
CT: control target
= control target key end

     0   :  { %10 = vsyncpa [#allocation3], 0  ;;  %s4194_s0 = inlined_call_operand.hbm [shape: bf16[16,128], index: 0, kind: input, shape index: {}]   ;;  %s4195_s1 = inlined_call_operand.hbm [shape: bf16[128,2048], index: 1, kind: input, shape index: {}]   ;;  %s4196_s2 = inlined_call_operand.hbm [shape: f32[1,2048], index: 2, kind: input, shape index: {}]   ;;  %s4197_s3 = inlined_call_operand.hbm [shape: bf16[2048,128], index: 3, kind: input, shape index: {}]   ;;  %s4198_s4 = inlined_call_operand.vmem [shape: f32[1,128], index: 4, kind: input, shape index: {}]   ;;  %s4199_s5 = inlined_call_operand.hbm [shape: f32[16,128], index: 5, kind: output, shape index: {}]  }
   0x1   :  { %12 = vsyncpa [#allocation3 + $0x1], 0 }
   0x2   :  { %13 = vsyncpa [#allocation6], 0 }
   0x3   :  { %14 = vsyncpa [#allocation9], 0 }
   0x4   :  { %15 = vsyncpa [#allocation4], 0 }
   0x5   :  { %17 = vsyncpa [#allocation4 + $0x1], 0  ;;  %s3851_s18 = smov 0   ;;  %s3853_s19 = smov 0  }
   0x6   :  { %s3855_s20 = smov 0   ;;  %s3857_s21 = smov 0  }
   0x7 LB: > { %s3872_s22 = sadd.s32 4294967295, %s3810_s21   ;;  %s2961_s23 = sadd.s32 4294967294, %s3810_s21   ;;  %s3810_s21 = sphi %s3857_s21, %s4222_s21   ;;  %s3806_s20 = sphi %s3855_s20, %s4221_s20   ;;  %s3802_s19 = sphi %s3853_s19, %s4220_s19   ;;  %s3798_s18 = sphi %s3851_s18, %s4219_s18  }
   0x8   : > { %p43_p0 = scmp.ne.s32.totalorder %s3802_s19, %s3798_s18  ;;  %p4200_p1 = scmp.eq.s32.totalorder %s3872_s22, 0 }
   0x9   : > { %p157_p3 = scmp.eq.s32.totalorder %s2961_s23, 1  ;;  %p2962_p5 = scmp.ge.s32.totalorder %s3810_s21, 1 }
   0xa   : > { %p3881_p4 = por %p4200_p1, %p43_p0  ;;  %p164_p7 = scmp.lt.s32.totalorder %s3810_s21, 3 }
   0xb   : > { %p3886_p6 = por %p157_p3, %p43_p0  ;;  %s3812_s27 = smov [#allocation5]  }
   0xc   : > { %s4203_s24 = scalar_select %p3881_p4, 1, 0 }
   0xd   : > { %s4204_s25 = scalar_select %p3886_p6, 1, 0 }
   0xe   : > { %p3891_p8 = pnand %p2962_p5, %p164_p7  ;;  %s176_s28 = sshll.u32 %s3812_s27, 4  ;;  %s3895_s28 = int_to_ptr.vmem [resolvable:$true] %s176_s28 }
   0xf   : > { %s3813_s30 = smov [#allocation7]   ;;  %s3814_s7 = smov [#allocation8]  }
  0x10   : > { %s4205_s26 = scalar_select %p3891_p8, 1, 0 }
  0x11   : > { %p3428_p9 = pneg %p3891_p8  ;;  %s190_s6 = sshll.u32 %s3813_s30, 4  ;;  %s3906_s6 = int_to_ptr.vmem [resolvable:$true] %s190_s6 }
  0x12   : > { %s3908_s8 = sshll.u32 %s3814_s7, 4  ;;  %s3622_s11 = scalar_lea.hbm %s4195_s1, 16384  ;;  %s201_s8 = int_to_ptr.vmem [resolvable:$true] %s3908_s8 }
  0x13   : > { %p3902_p11 = pnand %p3428_p9, %p4200_p1  ;;  %p3623_p12 = scmp.ne.s32.totalorder %s4195_s1, %s3622_s11 }
  0x14   : > { %p3629_p5 = scmp.lt.u32.totalorder %s3622_s11, %s4195_s1 }
  0x15   : > { %p3918_p13 = pneg %p3902_p11 }
  0x17   : > { %p3625_p0 = pnand %p3918_p13, %p3623_p12 }
  0x19   : > { %p3626_p3 = pneg %p3625_p0 }
  0x1b   : > { %p3631_p7 = pnand %p3629_p5, %p3626_p3 }
  0x1d   : > { %3634 = shalt.err (!%p3631_p7)
}
  0x1e   : > { %s3635_s17 = scalar_lea.vmem %s3895_s28, 16384  ;;  %p3643_p2 = scmp.lt.s32.totalorder %s3895_s28, %s3895_s28 }
  0x1f   : > { %p3636_p9 = scmp.ne.s32.totalorder %s3895_s28, %s3635_s17  ;;  %p3644_p6 = scmp.lt.s32.totalorder %s3635_s17, %s3635_s17 }
  0x21   : > { %p3638_p10 = pnand %p3636_p9, %p3918_p13  ;;  %p3645_p12 = por %p3644_p6, %p3643_p2 }
  0x23   : > { %p3639_p1 = pneg %p3638_p10 }
  0x25   : > { %p3646_p0 = pnand %p3645_p12, %p3639_p1 }
  0x27   : > { %3649 = shalt.err (!%p3646_p0)
}
  0x28   : > { %s3815_s23 = smov 1024   ;;  %s3816_s27 = smov 64  }
  0x29   : > { %3431 = dma.hbm_to_vmem [thread:$0]  (!%p3902_p11), %s4195_s1, 16384, %s3895_s28, [#allocation6], %s3815_s23, %s3815_s23, %s3816_s27  }
  0x2a   : > { %s3650_s11 = scalar_lea.hbm %s4196_s2, 256 }
  0x2b   : > { %p3651_p1 = scmp.ne.s32.totalorder %s4196_s2, %s3650_s11  ;;  %p3657_p10 = scmp.lt.u32.totalorder %s3650_s11, %s4196_s2 }
  0x2d   : > { %p3653_p2 = pnand %p3651_p1, %p3918_p13 }
  0x2f   : > { %p3654_p6 = pneg %p3653_p2 }
  0x31   : > { %p3659_p3 = pnand %p3657_p10, %p3654_p6 }
  0x33   : > { %3662 = shalt.err (!%p3659_p3)
}
  0x34   : > { %s3663_s28 = scalar_lea.vmem %s3906_s6, 256  ;;  %p3671_p12 = scmp.lt.s32.totalorder %s3906_s6, %s3906_s6 }
  0x35   : > { %p3664_p5 = scmp.ne.s32.totalorder %s3906_s6, %s3663_s28  ;;  %p3672_p0 = scmp.lt.s32.totalorder %s3663_s28, %s3663_s28 }
  0x37   : > { %p3666_p7 = pnand %p3664_p5, %p3918_p13  ;;  %p3673_p1 = por %p3672_p0, %p3671_p12 }
  0x39   : > { %p3667_p9 = pneg %p3666_p7 }
  0x3b   : > { %p3674_p2 = pnand %p3673_p1, %p3667_p9 }
  0x3d   : > { %3677 = shalt.err (!%p3674_p2)
}
  0x3e   : > { %3434 = dma.hbm_to_vmem [thread:$0]  (!%p3902_p11), %s4196_s2, 256, %s3906_s6, [#allocation6]  }
  0x3f   : > { %s3678_s9 = scalar_lea.hbm %s4197_s3, 16384 }
  0x40   : > { %p3679_p6 = scmp.ne.s32.totalorder %s4197_s3, %s3678_s9  ;;  %p3685_p5 = scmp.lt.u32.totalorder %s3678_s9, %s4197_s3 }
  0x42   : > { %p3681_p10 = pnand %p3679_p6, %p3918_p13 }
  0x44   : > { %p3682_p3 = pneg %p3681_p10 }
  0x46   : > { %p3687_p7 = pnand %p3685_p5, %p3682_p3 }
  0x48   : > { %3690 = shalt.err (!%p3687_p7)
}
  0x49   : > { %s3691_s15 = scalar_lea.vmem %s201_s8, 16384  ;;  %p3699_p1 = scmp.lt.s32.totalorder %s201_s8, %s201_s8 }
  0x4a   : > { %p3692_p9 = scmp.ne.s32.totalorder %s201_s8, %s3691_s15  ;;  %p3700_p2 = scmp.lt.s32.totalorder %s3691_s15, %s3691_s15 }
  0x4c   : > { %p3694_p12 = pnand %p3692_p9, %p3918_p13  ;;  %p3701_p4 = por %p3700_p2, %p3699_p1 }
  0x4e   : > { %p3695_p0 = pneg %p3694_p12 }
  0x50   : > { %p3702_p8 = pnand %p3701_p4, %p3695_p0 }
  0x52   : > { %3705 = shalt.err (!%p3702_p8)
}
  0x53   : > { %s3817_s6 = smov 4   ;;  %s3985_s14 = sadd.s32 1, %s3810_s21  }
  0x54   : > { %3437 = dma.hbm_to_vmem [thread:$0]  (!%p3902_p11), %s4197_s3, 16384, %s201_s8, [#allocation9], %s3816_s27, %s3816_s27, %s3817_s6  }
  0x55   : > { %s27_s29 = ssub.s32 %s3810_s21, %s3985_s14  ;;  %s30_s17 = sadd.s32 1, %s3806_s20 }
  0x56   : > { %p28_p4 = scmp.eq.s32.totalorder %s27_s29, 0  ;;  %p37_p8 = scmp.ne.s32.totalorder %s3806_s20, %s3802_s19 }
  0x57   : > { %p38_p13 = scmp.eq.s32.totalorder %s3810_s21, 0  ;;  %p4208_p10 = scmp.eq.s32.totalorder %s3872_s22, 1 }
  0x58   : > { %s3994_s23 = scalar_select %p28_p4, %s3806_s20, %s30_s17  }
  0x59   : > { %p39_p6 = por %p38_p13, %p37_p8  ;;  %p3998_p3 = por %p4208_p10, %p37_p8 }
  0x5a   : > { %p3449_p5 = scmp.lt.s32.totalorder %s3810_s21, 2  ;;  %s217_s7 = sand.u32 1, %s3806_s20  }
  0x5b   : > { %s2967_s9 = sshll.u32 %s217_s7, 2  ;;  %s2968_s8 = sshll.u32 %s3810_s21, 6 }
  0x5c   : > { %s4008_s11 = scalar_lea.hbm %s4194_s0, %s2968_s8  ;;  %s221_s12 = scalar_lea.vmem [#allocation2], %s2967_s9 }
  0x5d   : > { %s228_s13 = sshll.u32 %s221_s12, 4  ;;  %p4012_p11 = pnand %p3449_p5, %p39_p6  ;;  %s4010_s13 = int_to_ptr.vmem [resolvable:$true] %s228_s13 }
  0x5e   : > { %s218_s6 = scalar_lea.sflag [#allocation3], %s217_s7  ;;  %s3706_s16 = scalar_lea.hbm %s4008_s11, 64 }
  0x5f   : > { %p3707_p7 = scmp.ne.s32.totalorder %s4008_s11, %s3706_s16  ;;  %p3708_p9 = pneg %p4012_p11 }
  0x60   : > { %s3711_s17 = scalar_lea.hbm %s4194_s0, 128  ;;  %p3712_p1 = scmp.lt.u32.totalorder %s4008_s11, %s4194_s0 }
  0x61   : > { %p3709_p12 = pnand %p3708_p9, %p3707_p7  ;;  %p3713_p2 = scmp.lt.u32.totalorder %s3711_s17, %s3706_s16 }
  0x62   : > { %p3715_p8 = scmp.lt.u32.totalorder %s3706_s16, %s4008_s11 }
  0x63   : > { %p3710_p0 = pneg %p3709_p12  ;;  %p3714_p4 = por %p3713_p2, %p3712_p1 }
  0x65   : > { %p3716_p13 = por %p3715_p8, %p3714_p4 }
  0x67   : > { %p3717_p6 = pnand %p3716_p13, %p3710_p0 }
  0x69   : > { %3720 = shalt.err (!%p3717_p6)
}
  0x6a   : > { %s3721_s7 = scalar_lea.vmem %s4010_s13, 64  ;;  %s3818_s27 = smov [#allocation2]  }
  0x6b   : > { %p3722_p10 = scmp.ne.s32.totalorder %s4010_s13, %s3721_s7  ;;  %s3726_s10 = sshll.u32 %s3818_s27, 4  ;;  %s3727_s10 = int_to_ptr.vmem [resolvable:$false] %s3726_s10 }
  0x6c   : > { %s3728_s12 = scalar_lea.vmem %s3727_s10, 128  ;;  %p3729_p12 = scmp.lt.s32.totalorder %s4010_s13, %s3727_s10 }
  0x6d   : > { %p3724_p5 = pnand %p3722_p10, %p3708_p9  ;;  %p3730_p1 = scmp.lt.s32.totalorder %s3728_s12, %s3721_s7 }
  0x6f   : > { %p3725_p7 = pneg %p3724_p5  ;;  %p3731_p2 = por %p3730_p1, %p3729_p12 }
  0x71   : > { %p3732_p4 = pnand %p3731_p2, %p3725_p7 }
  0x73   : > { %3735 = shalt.err (!%p3732_p4)
}
  0x74   : > { %3441 = dma.hbm_to_vmem [thread:$0]  (!%p4012_p11), %s4008_s11, 64, %s4010_s13, %s218_s6  }
  0x75   : > { %p4211_p0 = scmp.ne.s32.totalorder %s4205_s26, 0 }
  0x76   : > { %s4044_s16 = sand.u32 (!%p4211_p0), 1, %s3802_s19   ;;  %p4212_p9 = scmp.ne.s32.totalorder (!%p4211_p0), %s4203_s24, 0 }
  0x77   : > { %237 = sbr.rel (%p4211_p0) target bundleno = 719 (0x2cf), region = 40  ;;  %s2970_s28 = sshll.u32 (!%p4211_p0), %s4044_s16, 2 }
  0x78   : > { %s240_s29 = scalar_lea.sflag (!%p4211_p0), [#allocation3], %s4044_s16  ;;  %s4048_s17 = scalar_lea.vmem (!%p4211_p0), [#allocation2], %s2970_s28 }
  0x7e   : > { %3781 = dma.done.wait (%p4212_p9), %s240_s29, 64  }
  0x7f   : > { %3783 = vsyncadd (%p4212_p9), %s240_s29, 4294967232  ;;  %p4213_p11 = scmp.eq.s32.totalorder %s3872_s22, 0 }
  0x81   : > { %3785 = dma.done.wait (%p4213_p11), [#allocation6], 16640   ;;  %p4214_p8 = pmov %p4213_p11 }
  0x83   : > { %3787 = vsyncadd (%p4214_p8), [#allocation6], 4294950656  ;;  %p4215_p13 = pmov %p4214_p8 }
  0x84   : > { %p4216_p6 = pmov %p4214_p8 }
  0x85   : > { %3789 = dma.done.wait (%p4215_p13), [#allocation9], 16384  }
  0x86   : > { %3791 = vsyncadd (%p4216_p6), [#allocation9], 4294950912  ;;  %v3819_v0 = vmov 0   ;;  %v284_v1 = vld [vmem:[#allocation5] sm:$0xff]  ;;  %v285_v3 = vld [vmem:[#allocation5 + $0x8] sm:$0xff]  ;;  %s2974_s11 = sshll.u32 %s4044_s16, 3 }
  0x87   : > { %1168 = vmatprep.mubr.bf16.mxu0 %v3819_v0  ;;  %1209 = vmatprep.mubr.bf16.mxu1 %v3819_v0  ;;  %v292_v2 = vld [vmem:[#allocation5 + $0x40] sm:$0xff]  ;;  %v293_v5 = vld [vmem:[#allocation5 + $0x48] sm:$0xff]  ;;  %v286_v63 = vld [vmem:[#allocation5 + $0x10] sm:$0xff]  ;;  %s3233_s13 = sshll.u32 %s3872_s22, 7  ;;  %s281_s15 = scalar_lea.vmem [#allocation10], %s2974_s11 }
  0x88   : > { %v2976_v4 = vcombine.high %v284_v1, %v292_v2  ;;  %v2975_v6 = vcombine.low %v284_v1, %v292_v2  ;;  %v300_v7 = vld [vmem:[#allocation5 + $0x80] sm:$0xff]  ;;  %v2978_v9 = vcombine.high %v285_v3, %v293_v5  ;;  %v2977_v10 = vcombine.low %v285_v3, %v293_v5  ;;  %v301_v12 = vld [vmem:[#allocation5 + $0x88] sm:$0xff]  ;;  %v294_v1 = vld [vmem:[#allocation5 + $0x50] sm:$0xff]  ;;  %s2862_s6 = sshll.u32 %s281_s15, 4  ;;  %s4150_s7 = scalar_lea.hbm %s4199_s5, %s3233_s13  ;;  %s4152_s6 = int_to_ptr.vmem [resolvable:$true] %s2862_s6 }
  0x89   : > { %v308_v8 = vld [vmem:[#allocation5 + $0xc0] sm:$0xff]  ;;  %v309_v13 = vld [vmem:[#allocation5 + $0xc8] sm:$0xff]  ;;  %v287_v2 = vld [vmem:[#allocation5 + $0x18] sm:$0xff]  ;;  %s2849_s27 = scalar_lea.sflag [#allocation4], %s4044_s16  ;;  %s3736_s10 = scalar_lea.vmem %s4152_s6, 128 }
  0x8a   : > { %v2992_v11 = vcombine.high %v300_v7, %v308_v8  ;;  %v316_v14 = vld [vmem:[#allocation5 + $0x100] sm:$0xff]  ;;  %1136 = vmatprep.subr.bf16.mxu0 %v2976_v4  ;;  %v2994_v15 = vcombine.high %v301_v12, %v309_v13  ;;  %v317_v17 = vld [vmem:[#allocation5 + $0x108] sm:$0xff]  ;;  %1177 = vmatprep.subr.bf16.mxu1 %v2978_v9  ;;  %v2991_v19 = vcombine.low %v300_v7, %v308_v8  ;;  %v295_v3 = vld [vmem:[#allocation5 + $0x58] sm:$0xff]  ;;  %p3737_p10 = scmp.ne.s32.totalorder %s4152_s6, %s3736_s10  ;;  %s3820_s22 = smov [#allocation10]  }
  0x8b   : > { %v324_v16 = vld [vmem:[#allocation5 + $0x140] sm:$0xff]  ;;  %v325_v18 = vld [vmem:[#allocation5 + $0x148] sm:$0xff]  ;;  %1137 = vmatpush1.bf16.msra.mxu0 %v2975_v6  ;;  %1178 = vmatpush1.bf16.msra.mxu1 %v2977_v10  ;;  %v2993_v20 = vcombine.low %v301_v12, %v309_v13  ;;  %v2980_v6 = vcombine.high %v286_v63, %v294_v1  ;;  %v2982_v7 = vcombine.high %v287_v2, %v295_v3  ;;  %v302_v8 = vld [vmem:[#allocation5 + $0x90] sm:$0xff]  ;;  %s3740_s12 = sshll.u32 %s3820_s22, 4  ;;  %s3741_s12 = int_to_ptr.vmem [resolvable:$false] %s3740_s12 }
  0x8c   : > { %1138 = vmatprep.subr.bf16.mxu0 %v2992_v11  ;;  %v3008_v21 = vcombine.high %v316_v14, %v324_v16  ;;  %1179 = vmatprep.subr.bf16.mxu1 %v2994_v15  ;;  %v3010_v22 = vcombine.high %v317_v17, %v325_v18  ;;  %v332_v23 = vld [vmem:[#allocation5 + $0x180] sm:$0xff]  ;;  %v333_v25 = vld [vmem:[#allocation5 + $0x188] sm:$0xff]  ;;  %v3007_v27 = vcombine.low %v316_v14, %v324_v16  ;;  %v310_v9 = vld [vmem:[#allocation5 + $0xd0] sm:$0xff]  ;;  %p3738_p5 = pnand %p3737_p10, %p3998_p3  ;;  %s3742_s28 = scalar_lea.vmem %s3741_s12, 256 }
  0x8d   : > { %v340_v24 = vld [vmem:[#allocation5 + $0x1c0] sm:$0xff]  ;;  %v341_v26 = vld [vmem:[#allocation5 + $0x1c8] sm:$0xff]  ;;  %v3009_v28 = vcombine.low %v317_v17, %v325_v18  ;;  %v303_v10 = vld [vmem:[#allocation5 + $0x98] sm:$0xff]  ;;  %v2979_v13 = vcombine.low %v286_v63, %v294_v1  ;;  %v2981_v14 = vcombine.low %v287_v2, %v295_v3  ;;  %v2996_v15 = vcombine.high %v302_v8, %v310_v9  ;;  %p3743_p12 = scmp.lt.s32.totalorder %s4152_s6, %s3741_s12  ;;  %p3744_p1 = scmp.lt.s32.totalorder %s3742_s28, %s3736_s10 }
  0x8e   : > { %v3024_v29 = vcombine.high %v332_v23, %v340_v24  ;;  %v3026_v30 = vcombine.high %v333_v25, %v341_v26  ;;  %v348_v31 = vld [vmem:[#allocation5 + $0x200] sm:$0xff]  ;;  %v349_v33 = vld [vmem:[#allocation5 + $0x208] sm:$0xff]  ;;  %v3023_v35 = vcombine.low %v332_v23, %v340_v24  ;;  %v3025_v36 = vcombine.low %v333_v25, %v341_v26  ;;  %v311_v11 = vld [vmem:[#allocation5 + $0xd8] sm:$0xff]  ;;  %p3739_p7 = pneg %p3738_p5 }
  0x8f   : > { %1139 = vmatpush1.bf16.msra.mxu0 %v2991_v19  ;;  %1180 = vmatpush1.bf16.msra.mxu1 %v2993_v20  ;;  %v356_v32 = vld [vmem:[#allocation5 + $0x240] sm:$0xff]  ;;  %v357_v34 = vld [vmem:[#allocation5 + $0x248] sm:$0xff]  ;;  %v4065_v12 = vld [vmem:[%s4048_s17] sm:$0xf]  ;;  %v2998_v16 = vcombine.high %v303_v10, %v311_v11  ;;  %p3745_p2 = por %p3744_p1, %p3743_p12 }
  0x90   : > { %1140 = vmatprep.subr.bf16.mxu0 %v3008_v21  ;;  %1181 = vmatprep.subr.bf16.mxu1 %v3010_v22  ;;  %v3040_v37 = vcombine.high %v348_v31, %v356_v32  ;;  %v3042_v38 = vcombine.high %v349_v33, %v357_v34  ;;  %v364_v39 = vld [vmem:[#allocation5 + $0x280] sm:$0xff]  ;;  %v365_v41 = vld [vmem:[#allocation5 + $0x288] sm:$0xff]  ;;  %v3039_v43 = vcombine.low %v348_v31, %v356_v32  ;;  %v318_v17 = vld [vmem:[#allocation5 + $0x110] sm:$0xff] }
  0x91   : > { %v372_v40 = vld [vmem:[#allocation5 + $0x2c0] sm:$0xff]  ;;  %v373_v42 = vld [vmem:[#allocation5 + $0x2c8] sm:$0xff]  ;;  %v3041_v44 = vcombine.low %v349_v33, %v357_v34  ;;  %v326_v18 = vld [vmem:[#allocation5 + $0x150] sm:$0xff]  ;;  %v2995_v21 = vcombine.low %v302_v8, %v310_v9  ;;  %v2997_v22 = vcombine.low %v303_v10, %v311_v11  ;;  %p3746_p4 = pnand %p3745_p2, %p3739_p7 }
  0x92   : > { %v3056_v45 = vcombine.high %v364_v39, %v372_v40  ;;  %v3058_v46 = vcombine.high %v365_v41, %v373_v42  ;;  %v380_v47 = vld [vmem:[#allocation5 + $0x300] sm:$0xff]  ;;  %v381_v49 = vld [vmem:[#allocation5 + $0x308] sm:$0xff]  ;;  %v3055_v51 = vcombine.low %v364_v39, %v372_v40  ;;  %v3057_v52 = vcombine.low %v365_v41, %v373_v42  ;;  %v319_v19 = vld [vmem:[#allocation5 + $0x118] sm:$0xff] }
  0x93   : > { %1141 = vmatpush1.bf16.msra.mxu0 %v3007_v27  ;;  %1182 = vmatpush1.bf16.msra.mxu1 %v3009_v28  ;;  %v388_v48 = vld [vmem:[#allocation5 + $0x340] sm:$0xff]  ;;  %v389_v50 = vld [vmem:[#allocation5 + $0x348] sm:$0xff]  ;;  %v327_v20 = vld [vmem:[#allocation5 + $0x158] sm:$0xff]  ;;  %v3012_v23 = vcombine.high %v318_v17, %v326_v18 }
  0x94   : > { %1142 = vmatprep.subr.bf16.mxu0 %v3024_v29  ;;  %1183 = vmatprep.subr.bf16.mxu1 %v3026_v30  ;;  %v3072_v53 = vcombine.high %v380_v47, %v388_v48  ;;  %v3074_v54 = vcombine.high %v381_v49, %v389_v50  ;;  %v396_v55 = vld [vmem:[#allocation5 + $0x380] sm:$0xff]  ;;  %v397_v57 = vld [vmem:[#allocation5 + $0x388] sm:$0xff]  ;;  %v3071_v59 = vcombine.low %v380_v47, %v388_v48  ;;  %v334_v25 = vld [vmem:[#allocation5 + $0x190] sm:$0xff] }
  0x95   : > { %v404_v56 = vld [vmem:[#allocation5 + $0x3c0] sm:$0xff]  ;;  %v405_v58 = vld [vmem:[#allocation5 + $0x3c8] sm:$0xff]  ;;  %v3073_v60 = vcombine.low %v381_v49, %v389_v50  ;;  %v3014_v24 = vcombine.high %v319_v19, %v327_v20  ;;  %v342_v26 = vld [vmem:[#allocation5 + $0x1d0] sm:$0xff]  ;;  %v3011_v29 = vcombine.low %v318_v17, %v326_v18  ;;  %v3013_v30 = vcombine.low %v319_v19, %v327_v20 }
  0x96   : > { %v3088_v61 = vcombine.high %v396_v55, %v404_v56  ;;  %v3090_v62 = vcombine.high %v397_v57, %v405_v58  ;;  %v3087_v4 = vcombine.low %v396_v55, %v404_v56  ;;  %v3089_v5 = vcombine.low %v397_v57, %v405_v58  ;;  %v335_v27 = vld [vmem:[#allocation5 + $0x198] sm:$0xff]  ;;  %v350_v33 = vld [vmem:[#allocation5 + $0x210] sm:$0xff]  ;;  %v296_v2 = vld [vmem:[#allocation5 + $0x60] sm:$0xff] }
  0x97   : > { %1143 = vmatpush1.bf16.msra.mxu0 %v3023_v35  ;;  %1184 = vmatpush1.bf16.msra.mxu1 %v3025_v36  ;;  %v343_v28 = vld [vmem:[#allocation5 + $0x1d8] sm:$0xff]  ;;  %v3028_v31 = vcombine.high %v334_v25, %v342_v26  ;;  %v358_v34 = vld [vmem:[#allocation5 + $0x250] sm:$0xff]  ;;  %v312_v10 = vld [vmem:[#allocation5 + $0xe0] sm:$0xff] }
  0x98   : > { %1144 = vmatprep.subr.bf16.mxu0 %v3040_v37  ;;  %1185 = vmatprep.subr.bf16.mxu1 %v3042_v38  ;;  %v3030_v32 = vcombine.high %v335_v27, %v343_v28  ;;  %v351_v35 = vld [vmem:[#allocation5 + $0x218] sm:$0xff]  ;;  %v3027_v37 = vcombine.low %v334_v25, %v342_v26  ;;  %v366_v38 = vld [vmem:[#allocation5 + $0x290] sm:$0xff]  ;;  %v3029_v39 = vcombine.low %v335_v27, %v343_v28  ;;  %v328_v19 = vld [vmem:[#allocation5 + $0x160] sm:$0xff] }
  0x99   : > { %v359_v36 = vld [vmem:[#allocation5 + $0x258] sm:$0xff]  ;;  %v3044_v40 = vcombine.high %v350_v33, %v358_v34  ;;  %v374_v41 = vld [vmem:[#allocation5 + $0x2d0] sm:$0xff]  ;;  %v344_v25 = vld [vmem:[#allocation5 + $0x1e0] sm:$0xff] }
  0x9a   : > { %v3046_v42 = vcombine.high %v351_v35, %v359_v36  ;;  %v3045_v47 = vcombine.low %v351_v35, %v359_v36  ;;  %v3060_v48 = vcombine.high %v366_v38, %v374_v41  ;;  %v390_v49 = vld [vmem:[#allocation5 + $0x350] sm:$0xff]  ;;  %v337_v28 = vld [vmem:[#allocation5 + $0x1a8] sm:$0xff] }
  0x9b   : > { %1145 = vmatpush1.bf16.msra.mxu0 %v3039_v43  ;;  %1186 = vmatpush1.bf16.msra.mxu1 %v3041_v44  ;;  %v367_v43 = vld [vmem:[#allocation5 + $0x298] sm:$0xff]  ;;  %v406_v57 = vld [vmem:[#allocation5 + $0x3d0] sm:$0xff]  ;;  %v353_v36 = vld [vmem:[#allocation5 + $0x228] sm:$0xff] }
  0x9c   : > { %1146 = vmatprep.subr.bf16.mxu0 %v3056_v45  ;;  %1187 = vmatprep.subr.bf16.mxu1 %v3058_v46  ;;  %v375_v44 = vld [vmem:[#allocation5 + $0x2d8] sm:$0xff]  ;;  %v3043_v45 = vcombine.low %v350_v33, %v358_v34  ;;  %v382_v46 = vld [vmem:[#allocation5 + $0x310] sm:$0xff]  ;;  %v360_v33 = vld [vmem:[#allocation5 + $0x260] sm:$0xff] }
  0x9d   : > { %v3062_v50 = vcombine.high %v367_v43, %v375_v44  ;;  %v3061_v55 = vcombine.low %v367_v43, %v375_v44  ;;  %v3076_v56 = vcombine.high %v382_v46, %v390_v49  ;;  %v369_v44 = vld [vmem:[#allocation5 + $0x2a8] sm:$0xff] }
  0x9f   : > { %1147 = vmatpush1.bf16.msra.mxu0 %v3055_v51  ;;  %1188 = vmatpush1.bf16.msra.mxu1 %v3057_v52  ;;  %v383_v51 = vld [vmem:[#allocation5 + $0x318] sm:$0xff] }
  0xa0   : > { %1148 = vmatprep.subr.bf16.mxu0 %v3072_v53  ;;  %1189 = vmatprep.subr.bf16.mxu1 %v3074_v54  ;;  %v391_v52 = vld [vmem:[#allocation5 + $0x358] sm:$0xff]  ;;  %v3059_v53 = vcombine.low %v366_v38, %v374_v41  ;;  %v398_v54 = vld [vmem:[#allocation5 + $0x390] sm:$0xff]  ;;  %v376_v41 = vld [vmem:[#allocation5 + $0x2e0] sm:$0xff] }
  0xa1   : > { %v3078_v58 = vcombine.high %v383_v51, %v391_v52  ;;  %v3077_v63 = vcombine.low %v383_v51, %v391_v52  ;;  %v3092_v1 = vcombine.high %v398_v54, %v406_v57  ;;  %v385_v52 = vld [vmem:[#allocation5 + $0x328] sm:$0xff] }
  0xa3   : > { %1149 = vmatpush1.bf16.msra.mxu0 %v3071_v59  ;;  %1190 = vmatpush1.bf16.msra.mxu1 %v3073_v60  ;;  %v399_v59 = vld [vmem:[#allocation5 + $0x398] sm:$0xff] }
  0xa4   : > { %1150 = vmatprep.subr.bf16.mxu0 %v3088_v61  ;;  %1191 = vmatprep.subr.bf16.mxu1 %v3090_v62  ;;  %v407_v60 = vld [vmem:[#allocation5 + $0x3d8] sm:$0xff]  ;;  %v3075_v61 = vcombine.low %v382_v46, %v390_v49  ;;  %v288_v62 = vld [vmem:[#allocation5 + $0x20] sm:$0xff] }
  0xa5   : > { %v3094_v3 = vcombine.high %v399_v59, %v407_v60  ;;  %v3093_v8 = vcombine.low %v399_v59, %v407_v60  ;;  %v2984_v9 = vcombine.high %v288_v62, %v296_v2  ;;  %v392_v49 = vld [vmem:[#allocation5 + $0x360] sm:$0xff]  ;;  %v401_v60 = vld [vmem:[#allocation5 + $0x3a8] sm:$0xff] }
  0xa7   : > { %1151 = vmatpush1.bf16.msra.mxu0 %v3087_v4  ;;  %1192 = vmatpush1.bf16.msra.mxu1 %v3089_v5  ;;  %v289_v4 = vld [vmem:[#allocation5 + $0x28] sm:$0xff] }
  0xa8   : > { %1218 = vmatprep.subr.bf16.mxu0 %v2980_v6  ;;  %1259 = vmatprep.subr.bf16.mxu1 %v2982_v7  ;;  %v297_v5 = vld [vmem:[#allocation5 + $0x68] sm:$0xff]  ;;  %v3091_v6 = vcombine.low %v398_v54, %v406_v57  ;;  %v304_v7 = vld [vmem:[#allocation5 + $0xa0] sm:$0xff] }
  0xa9   : > { %v2986_v11 = vcombine.high %v289_v4, %v297_v5  ;;  %v2985_v17 = vcombine.low %v289_v4, %v297_v5  ;;  %v3000_v18 = vcombine.high %v304_v7, %v312_v10  ;;  %v408_v57 = vld [vmem:[#allocation5 + $0x3e0] sm:$0xff]  ;;  %v291_v5 = vld [vmem:[#allocation5 + $0x38] sm:$0xff] }
  0xaa   : > { %1169 = vmatmul.mubr.bf16.vlgmr.msra.gmra.mrb[0].mxu0 %v4065_v12  ;;  %1210 = vmatmul.mubr.bf16.vlgmr.msra.gmra.mrb[0].mxu1 %v4065_v12 }
  0xab   : > { %1219 = vmatpush1.bf16.msra.mxu0 %v2979_v13  ;;  %1260 = vmatpush1.bf16.msra.mxu1 %v2981_v14  ;;  %v305_v13 = vld [vmem:[#allocation5 + $0xa8] sm:$0xff] }
  0xac   : > { %1220 = vmatprep.subr.bf16.mxu0 %v2996_v15  ;;  %1261 = vmatprep.subr.bf16.mxu1 %v2998_v16  ;;  %v313_v14 = vld [vmem:[#allocation5 + $0xe8] sm:$0xff]  ;;  %v2983_v15 = vcombine.low %v288_v62, %v296_v2  ;;  %v320_v16 = vld [vmem:[#allocation5 + $0x120] sm:$0xff]  ;;  %v298_v2 = vld [vmem:[#allocation5 + $0x70] sm:$0xff] }
  0xad   : > { %1250 = vmatprep.mubr.bf16.mxu0 %v3819_v0  ;;  %1291 = vmatprep.mubr.bf16.mxu1 %v3819_v0  ;;  %v3002_v20 = vcombine.high %v305_v13, %v313_v14  ;;  %v3001_v26 = vcombine.low %v305_v13, %v313_v14  ;;  %v3016_v27 = vcombine.high %v320_v16, %v328_v19  ;;  %v307_v14 = vld [vmem:[#allocation5 + $0xb8] sm:$0xff] }
  0xaf   : > { %1221 = vmatpush1.bf16.msra.mxu0 %v2995_v21  ;;  %1262 = vmatpush1.bf16.msra.mxu1 %v2997_v22  ;;  %v321_v21 = vld [vmem:[#allocation5 + $0x128] sm:$0xff] }
  0xb0   : > { %1222 = vmatprep.subr.bf16.mxu0 %v3012_v23  ;;  %1263 = vmatprep.subr.bf16.mxu1 %v3014_v24  ;;  %v329_v22 = vld [vmem:[#allocation5 + $0x168] sm:$0xff]  ;;  %v2999_v23 = vcombine.low %v304_v7, %v312_v10  ;;  %v336_v24 = vld [vmem:[#allocation5 + $0x1a0] sm:$0xff]  ;;  %v314_v10 = vld [vmem:[#allocation5 + $0xf0] sm:$0xff] }
  0xb1   : > { %v3017_v34 = vcombine.low %v321_v21, %v329_v22  ;;  %v3032_v35 = vcombine.high %v336_v24, %v344_v25 }
  0xb3   : > { %1223 = vmatpush1.bf16.msra.mxu0 %v3011_v29  ;;  %1264 = vmatpush1.bf16.msra.mxu1 %v3013_v30  ;;  %v345_v29 = vld [vmem:[#allocation5 + $0x1e8] sm:$0xff]  ;;  %v3018_v30 = vcombine.high %v321_v21, %v329_v22  ;;  %v323_v22 = vld [vmem:[#allocation5 + $0x138] sm:$0xff] }
  0xb4   : > { %1224 = vmatprep.subr.bf16.mxu0 %v3028_v31  ;;  %1265 = vmatprep.subr.bf16.mxu1 %v3030_v32  ;;  %v3015_v31 = vcombine.low %v320_v16, %v328_v19  ;;  %v352_v32 = vld [vmem:[#allocation5 + $0x220] sm:$0xff]  ;;  %v3034_v38 = vcombine.high %v337_v28, %v345_v29  ;;  %v330_v19 = vld [vmem:[#allocation5 + $0x170] sm:$0xff] }
  0xb5   : > { %v3048_v43 = vcombine.high %v352_v32, %v360_v33 }
  0xb7   : > { %1225 = vmatpush1.bf16.msra.mxu0 %v3027_v37  ;;  %1266 = vmatpush1.bf16.msra.mxu1 %v3029_v39  ;;  %v361_v37 = vld [vmem:[#allocation5 + $0x268] sm:$0xff]  ;;  %v3031_v39 = vcombine.low %v336_v24, %v344_v25 }
  0xb8   : > { %1226 = vmatprep.subr.bf16.mxu0 %v3044_v40  ;;  %1267 = vmatprep.subr.bf16.mxu1 %v3046_v42  ;;  %v368_v40 = vld [vmem:[#allocation5 + $0x2a0] sm:$0xff]  ;;  %v3033_v42 = vcombine.low %v337_v28, %v345_v29  ;;  %v3050_v46 = vcombine.high %v353_v36, %v361_v37 }
  0xb9   : > { %v3064_v51 = vcombine.high %v368_v40, %v376_v41 }
  0xbb   : > { %1227 = vmatpush1.bf16.msra.mxu0 %v3043_v45  ;;  %1268 = vmatpush1.bf16.msra.mxu1 %v3045_v47  ;;  %v377_v45 = vld [vmem:[#allocation5 + $0x2e8] sm:$0xff]  ;;  %v3047_v47 = vcombine.low %v352_v32, %v360_v33 }
  0xbc   : > { %1228 = vmatprep.subr.bf16.mxu0 %v3060_v48  ;;  %1269 = vmatprep.subr.bf16.mxu1 %v3062_v50  ;;  %v384_v48 = vld [vmem:[#allocation5 + $0x320] sm:$0xff]  ;;  %v3049_v50 = vcombine.low %v353_v36, %v361_v37  ;;  %v3066_v54 = vcombine.high %v369_v44, %v377_v45  ;;  %v355_v37 = vld [vmem:[#allocation5 + $0x238] sm:$0xff] }
  0xbd   : > { %v3080_v59 = vcombine.high %v384_v48, %v392_v49 }
  0xbf   : > { %1229 = vmatpush1.bf16.msra.mxu0 %v3059_v53  ;;  %1270 = vmatpush1.bf16.msra.mxu1 %v3061_v55  ;;  %v393_v53 = vld [vmem:[#allocation5 + $0x368] sm:$0xff]  ;;  %v3063_v55 = vcombine.low %v368_v40, %v376_v41  ;;  %v370_v41 = vld [vmem:[#allocation5 + $0x2b0] sm:$0xff] }
  0xc0   : > { %1230 = vmatprep.subr.bf16.mxu0 %v3076_v56  ;;  %1271 = vmatprep.subr.bf16.mxu1 %v3078_v58  ;;  %v400_v56 = vld [vmem:[#allocation5 + $0x3a0] sm:$0xff]  ;;  %v3065_v58 = vcombine.low %v369_v44, %v377_v45  ;;  %v3082_v62 = vcombine.high %v385_v52, %v393_v53  ;;  %v371_v44 = vld [vmem:[#allocation5 + $0x2b8] sm:$0xff] }
  0xc1   : > { %v3096_v4 = vcombine.high %v400_v56, %v408_v57  ;;  %v379_v45 = vld [vmem:[#allocation5 + $0x2f8] sm:$0xff] }
  0xc3   : > { %1231 = vmatpush1.bf16.msra.mxu0 %v3075_v61  ;;  %1272 = vmatpush1.bf16.msra.mxu1 %v3077_v63  ;;  %v409_v61 = vld [vmem:[#allocation5 + $0x3e8] sm:$0xff]  ;;  %v3079_v63 = vcombine.low %v384_v48, %v392_v49  ;;  %v386_v48 = vld [vmem:[#allocation5 + $0x330] sm:$0xff] }
  0xc4   : > { %1232 = vmatprep.subr.bf16.mxu0 %v3092_v1  ;;  %1273 = vmatprep.subr.bf16.mxu1 %v3094_v3  ;;  %v290_v1 = vld [vmem:[#allocation5 + $0x30] sm:$0xff]  ;;  %v3081_v3 = vcombine.low %v385_v52, %v393_v53  ;;  %v3098_v7 = vcombine.high %v401_v60, %v409_v61  ;;  %v387_v52 = vld [vmem:[#allocation5 + $0x338] sm:$0xff] }
  0xc5   : > { %v2988_v13 = vcombine.high %v290_v1, %v298_v2  ;;  %v394_v49 = vld [vmem:[#allocation5 + $0x370] sm:$0xff]  ;;  %v395_v53 = vld [vmem:[#allocation5 + $0x378] sm:$0xff] }
  0xc7   : > { %1233 = vmatpush1.bf16.msra.mxu0 %v3091_v6  ;;  %1274 = vmatpush1.bf16.msra.mxu1 %v3093_v8  ;;  %v299_v6 = vld [vmem:[#allocation5 + $0x78] sm:$0xff]  ;;  %v3095_v8 = vcombine.low %v400_v56, %v408_v57  ;;  %v3069_v56 = vcombine.low %v371_v44, %v379_v45  ;;  %v3084_v57 = vcombine.high %v386_v48, %v394_v49 }
  0xc8   : > { %1300 = vmatprep.subr.bf16.mxu0 %v2984_v9  ;;  %1341 = vmatprep.subr.bf16.mxu1 %v2986_v11  ;;  %v306_v9 = vld [vmem:[#allocation5 + $0xb0] sm:$0xff]  ;;  %v3097_v11 = vcombine.low %v401_v60, %v409_v61  ;;  %v2990_v16 = vcombine.high %v291_v5, %v299_v6  ;;  %v403_v61 = vld [vmem:[#allocation5 + $0x3b8] sm:$0xff] }
  0xc9   : > { %v3004_v21 = vcombine.high %v306_v9, %v314_v10  ;;  %v3003_v25 = vcombine.low %v306_v9, %v314_v10  ;;  %v410_v60 = vld [vmem:[#allocation5 + $0x3f0] sm:$0xff]  ;;  %v3497_v10 = vld [vmem:[#allocation8 + $0x48] sm:$0xff]  }
  0xca   : > { %1251 = vmatmul.mubr.bf16.vlgmr.msra.gmra.mrb[4].mxu0 %v4065_v12  ;;  %1292 = vmatmul.mubr.bf16.vlgmr.msra.gmra.mrb[4].mxu1 %v4065_v12  ;;  %v3496_v9 = vld [vmem:[#allocation8 + $0x80] sm:$0xff]  }
  0xcb   : > { %1301 = vmatpush1.bf16.msra.mxu0 %v2983_v15  ;;  %1342 = vmatpush1.bf16.msra.mxu1 %v2985_v17  ;;  %v315_v15 = vld [vmem:[#allocation5 + $0xf8] sm:$0xff]  ;;  %v2987_v17 = vcombine.low %v290_v1, %v298_v2  ;;  %v3085_v1 = vcombine.low %v387_v52, %v395_v53 }
  0xcc   : > { %1302 = vmatprep.subr.bf16.mxu0 %v3000_v18  ;;  %1343 = vmatprep.subr.bf16.mxu1 %v3002_v20  ;;  %v322_v18 = vld [vmem:[#allocation5 + $0x130] sm:$0xff]  ;;  %v2989_v20 = vcombine.low %v291_v5, %v299_v6  ;;  %v3006_v24 = vcombine.high %v307_v14, %v315_v15  ;;  %v3005_v28 = vcombine.low %v307_v14, %v315_v15  ;;  %v3499_v14 = vld [vmem:[#allocation8 + $0x8] sm:$0xff]  }
  0xcd   : > { %1332 = vmatprep.mubr.bf16.mxu0 %v3819_v0  ;;  %1373 = vmatprep.mubr.bf16.mxu1 %v3819_v0  ;;  %v3020_v29 = vcombine.high %v322_v18, %v330_v19  ;;  %v3019_v33 = vcombine.low %v322_v18, %v330_v19  ;;  %v3500_v15 = vld [vmem:[#allocation8 + $0x88] sm:$0xff]   ;;  %v3503_v18 = vld [vmem:[#allocation8 + $0x10] sm:$0xff]  }
  0xce   : > { %v3504_v19 = vld [vmem:[#allocation8 + $0x90] sm:$0xff]  }
  0xcf   : > { %1303 = vmatpush1.bf16.msra.mxu0 %v2999_v23  ;;  %1344 = vmatpush1.bf16.msra.mxu1 %v3001_v26  ;;  %v331_v23 = vld [vmem:[#allocation5 + $0x178] sm:$0xff]  ;;  %v338_v26 = vld [vmem:[#allocation5 + $0x1b0] sm:$0xff] }
  0xd0   : > { %1304 = vmatprep.subr.bf16.mxu0 %v3016_v27  ;;  %1345 = vmatprep.subr.bf16.mxu1 %v3018_v30  ;;  %v346_v27 = vld [vmem:[#allocation5 + $0x1f0] sm:$0xff]  ;;  %v339_v30 = vld [vmem:[#allocation5 + $0x1b8] sm:$0xff]  ;;  %v3022_v32 = vcombine.high %v323_v22, %v331_v23 }
  0xd1   : > { %v3036_v36 = vcombine.high %v338_v26, %v346_v27  ;;  %v3035_v40 = vcombine.low %v338_v26, %v346_v27  ;;  %v3511_v26 = vld [vmem:[#allocation8 + $0x20] sm:$0xff]  }
  0xd2   : > { %v3512_v27 = vld [vmem:[#allocation8 + $0xa0] sm:$0xff]  }
  0xd3   : > { %1305 = vmatpush1.bf16.msra.mxu0 %v3015_v31  ;;  %1346 = vmatpush1.bf16.msra.mxu1 %v3017_v34  ;;  %v347_v31 = vld [vmem:[#allocation5 + $0x1f8] sm:$0xff]  ;;  %v354_v34 = vld [vmem:[#allocation5 + $0x230] sm:$0xff] }
  0xd4   : > { %1306 = vmatprep.subr.bf16.mxu0 %v3032_v35  ;;  %1347 = vmatprep.subr.bf16.mxu1 %v3034_v38  ;;  %v3021_v35 = vcombine.low %v323_v22, %v331_v23  ;;  %v363_v38 = vld [vmem:[#allocation5 + $0x278] sm:$0xff]  ;;  %v3507_v22 = vld [vmem:[#allocation8 + $0x18] sm:$0xff]  }
  0xd5   : > { %v3508_v23 = vld [vmem:[#allocation8 + $0x98] sm:$0xff]  }
  0xd7   : > { %1307 = vmatpush1.bf16.msra.mxu0 %v3031_v39  ;;  %1348 = vmatpush1.bf16.msra.mxu1 %v3033_v42  ;;  %v3038_v39 = vcombine.high %v339_v30, %v347_v31  ;;  %v378_v42 = vld [vmem:[#allocation5 + $0x2f0] sm:$0xff] }
  0xd8   : > { %1308 = vmatprep.subr.bf16.mxu0 %v3048_v43  ;;  %1349 = vmatprep.subr.bf16.mxu1 %v3050_v46  ;;  %v3037_v43 = vcombine.low %v339_v30, %v347_v31  ;;  %v3054_v46 = vcombine.high %v355_v37, %v363_v38  ;;  %v3515_v30 = vld [vmem:[#allocation8 + $0x28] sm:$0xff]  }
  0xd9   : > { %v3516_v31 = vld [vmem:[#allocation8 + $0xa8] sm:$0xff]  }
  0xdb   : > { %1309 = vmatpush1.bf16.msra.mxu0 %v3047_v47  ;;  %1350 = vmatpush1.bf16.msra.mxu1 %v3049_v50  ;;  %v3053_v50 = vcombine.low %v355_v37, %v363_v38  ;;  %v3523_v37 = vld [vmem:[#allocation8 + $0x38] sm:$0xff]  }
  0xdc   : > { %1310 = vmatprep.subr.bf16.mxu0 %v3064_v51  ;;  %1351 = vmatprep.subr.bf16.mxu1 %v3066_v54  ;;  %v3068_v51 = vcombine.high %v370_v41, %v378_v42  ;;  %v3070_v54 = vcombine.high %v371_v44, %v379_v45  ;;  %v3524_v38 = vld [vmem:[#allocation8 + $0xb8] sm:$0xff]  }
  0xdf   : > { %1311 = vmatpush1.bf16.msra.mxu0 %v3063_v55  ;;  %1352 = vmatpush1.bf16.msra.mxu1 %v3065_v58  ;;  %v3067_v55 = vcombine.low %v370_v41, %v378_v42  ;;  %v3086_v58 = vcombine.high %v387_v52, %v395_v53  ;;  %v416_v41 = vlaneseq }
  0xe0   : > { %1312 = vmatprep.subr.bf16.mxu0 %v3080_v59  ;;  %1353 = vmatprep.subr.bf16.mxu1 %v3082_v62  ;;  %v402_v59 = vld [vmem:[#allocation5 + $0x3b0] sm:$0xff]  ;;  %v411_v62 = vld [vmem:[#allocation5 + $0x3f8] sm:$0xff] }
  0xe1   : > { %v3100_v2 = vcombine.high %v402_v59, %v410_v60  ;;  %v3099_v5 = vcombine.low %v402_v59, %v410_v60  ;;  %v3101_v6 = vcombine.low %v403_v61, %v411_v62  ;;  %v4080_v42 = vshrl.u32 %v416_v41, 7  ;;  %v3552_v41 = vld [vmem:[#allocation8 + $0x1b0] sm:$0xff]  }
  0xe3   : > { %1313 = vmatpush1.bf16.msra.mxu0 %v3079_v63  ;;  %1354 = vmatpush1.bf16.msra.mxu1 %v3081_v3  ;;  %v3083_v63 = vcombine.low %v386_v48, %v394_v49  ;;  %v3102_v3 = vcombine.high %v403_v61, %v411_v62  ;;  %v426_v44 = vsub.s32 2, %v4080_v42  ;;  %v422_v45 = vsub.s32 1, %v4080_v42 }
  0xe4   : > { %1314 = vmatprep.subr.bf16.mxu0 %v3096_v4  ;;  %1355 = vmatprep.subr.bf16.mxu1 %v3098_v7  ;;  %v3493_v4 = vld [vmem:[#allocation8 + $0x40] sm:$0xff]  }
  0xe5   : > { %v3494_v7 = vld [vmem:[#allocation8 + $0xc0] sm:$0xff]  }
  0xe7   : > { %1315 = vmatpush1.bf16.msra.mxu0 %v3095_v8  ;;  %1356 = vmatpush1.bf16.msra.mxu1 %v3097_v11  ;;  %v3495_v8 = vld [vmem:[#allocation8] sm:$0xff]   ;;  %v3498_v11 = vld [vmem:[#allocation8 + $0xc8] sm:$0xff]  }
  0xe8   : > { %1382 = vmatprep.subr.bf16.mxu0 %v2988_v13  ;;  %1423 = vmatprep.subr.bf16.mxu1 %v2990_v16  ;;  %v3621_v13 = vld [vmem:[%s4048_s17] sm:$0xf]  ;;  %v3501_v16 = vld [vmem:[#allocation8 + $0x50] sm:$0xff]  }
  0xea   : > { %1333 = vmatmul.mubr.bf16.vlgmr.msra.gmra.mrb[8].mxu0 %v4065_v12  ;;  %1374 = vmatmul.mubr.bf16.vlgmr.msra.gmra.mrb[8].mxu1 %v4065_v12  ;;  %v362_v12 = vld [vmem:[#allocation5 + $0x270] sm:$0xff] }
  0xeb   : > { %1383 = vmatpush1.bf16.msra.mxu0 %v2987_v17  ;;  %1424 = vmatpush1.bf16.msra.mxu1 %v2989_v20  ;;  %v3051_v47 = vcombine.low %v354_v34, %v362_v12  ;;  %v3502_v17 = vld [vmem:[#allocation8 + $0xd0] sm:$0xff]   ;;  %v3505_v20 = vld [vmem:[#allocation8 + $0x58] sm:$0xff]  }
  0xec   : > { %1384 = vmatprep.subr.bf16.mxu0 %v3004_v21  ;;  %1425 = vmatprep.subr.bf16.mxu1 %v3006_v24  ;;  %v3506_v21 = vld [vmem:[#allocation8 + $0xd8] sm:$0xff]   ;;  %v3509_v24 = vld [vmem:[#allocation8 + $0x60] sm:$0xff]  }
  0xed   : > { %1414 = vmatprep.mubr.bf16.mxu0 %v3819_v0  ;;  %1455 = vmatprep.mubr.bf16.mxu1 %v3819_v0  ;;  %v3052_v0 = vcombine.high %v354_v34, %v362_v12  ;;  %v3519_v34 = vld [vmem:[#allocation8 + $0x30] sm:$0xff]  }
  0xee   : > { %v3520_v12 = vld [vmem:[#allocation8 + $0xb0] sm:$0xff]  }
  0xef   : > { %1385 = vmatpush1.bf16.msra.mxu0 %v3003_v25  ;;  %1426 = vmatpush1.bf16.msra.mxu1 %v3005_v28  ;;  %v3510_v25 = vld [vmem:[#allocation8 + $0xe0] sm:$0xff]   ;;  %v3513_v28 = vld [vmem:[#allocation8 + $0x68] sm:$0xff]  }
  0xf0   : > { %1386 = vmatprep.subr.bf16.mxu0 %v3020_v29  ;;  %1427 = vmatprep.subr.bf16.mxu1 %v3022_v32  ;;  %v3514_v29 = vld [vmem:[#allocation8 + $0xe8] sm:$0xff]   ;;  %v3517_v32 = vld [vmem:[#allocation8 + $0x70] sm:$0xff]  }
  0xf3   : > { %1387 = vmatpush1.bf16.msra.mxu0 %v3019_v33  ;;  %1428 = vmatpush1.bf16.msra.mxu1 %v3021_v35  ;;  %v3518_v33 = vld [vmem:[#allocation8 + $0xf0] sm:$0xff]   ;;  %v3521_v35 = vld [vmem:[#allocation8 + $0x78] sm:$0xff]  }
  0xf4   : > { %1388 = vmatprep.subr.bf16.mxu0 %v3036_v36  ;;  %1429 = vmatprep.subr.bf16.mxu1 %v3038_v39  ;;  %v3522_v36 = vld [vmem:[#allocation8 + $0xf8] sm:$0xff]   ;;  %v3525_v39 = vld [vmem:[#allocation8 + $0x140] sm:$0xff]  }
  0xf7   : > { %1389 = vmatpush1.bf16.msra.mxu0 %v3035_v40  ;;  %1430 = vmatpush1.bf16.msra.mxu1 %v3037_v43  ;;  %v3526_v40 = vld [vmem:[#allocation8 + $0x1c0] sm:$0xff]   ;;  %v418_v43 = vsub.s32 0, %v4080_v42 }
  0xf8   : > { %1390 = vmatprep.subr.bf16.mxu0 %v3052_v0  ;;  %1431 = vmatprep.subr.bf16.mxu1 %v3054_v46  ;;  %v4083_v0 = vld [vmem:[#allocation7] sm:$0xff]  ;;  %v430_v46 = vsub.s32 3, %v4080_v42 }
  0xf9   : > { %v427_v48 = vrot.slane %v4083_v0, %v426_v44  ;;  %v423_v49 = vrot.slane %v4083_v0, %v422_v45 }
  0xfb   : > { %1391 = vmatpush1.bf16.msra.mxu0 %v3051_v47  ;;  %1432 = vmatpush1.bf16.msra.mxu1 %v3053_v50  ;;  %v419_v47 = vrot.slane %v4083_v0, %v418_v43  ;;  %v431_v50 = vrot.slane %v4083_v0, %v430_v46 }
  0xfc   : > { %1392 = vmatprep.subr.bf16.mxu0 %v3068_v51  ;;  %1433 = vmatprep.subr.bf16.mxu1 %v3070_v54 }
  0xff   : > { %1393 = vmatpush1.bf16.msra.mxu0 %v3067_v55  ;;  %1434 = vmatpush1.bf16.msra.mxu1 %v3069_v56 }
 0x100   : > { %1394 = vmatprep.subr.bf16.mxu0 %v3084_v57  ;;  %1435 = vmatprep.subr.bf16.mxu1 %v3086_v58 }
 0x103   : > { %1395 = vmatpush1.bf16.msra.mxu0 %v3083_v63  ;;  %1436 = vmatpush1.bf16.msra.mxu1 %v3085_v1 }
 0x104   : > { %1396 = vmatprep.subr.bf16.mxu0 %v3100_v2  ;;  %1437 = vmatprep.subr.bf16.mxu1 %v3102_v3 }
 0x107   : > { %1397 = vmatpush1.bf16.msra.mxu0 %v3099_v5  ;;  %1438 = vmatpush1.bf16.msra.mxu1 %v3101_v6 }
 0x108   : > { %3236 = vmatprep.subr.bf16.mxu0 %v3493_v4  ;;  %3258 = vmatprep.subr.bf16.mxu1 %v3494_v7  ;;  %v3527_v7 = vld [vmem:[#allocation8 + $0x100] sm:$0xff]  }
 0x10a   : > { %1415 = vmatmul.mubr.bf16.vlgmr.msra.gmra.mrb[12].mxu0 %v3621_v13  ;;  %1456 = vmatmul.mubr.bf16.vlgmr.msra.gmra.mrb[12].mxu1 %v3621_v13  ;;  %v3531_v13 = vld [vmem:[#allocation8 + $0x108] sm:$0xff]  }
 0x10b   : > { %3237 = vmatpush3.bf16.msra.mxu0 %v3495_v8  ;;  %3259 = vmatpush3.bf16.msra.mxu1 %v3496_v9  ;;  %v3528_v9 = vld [vmem:[#allocation8 + $0x180] sm:$0xff]  }
 0x10c   : > { %3238 = vmatprep.subr.bf16.mxu0 %v3497_v10  ;;  %3260 = vmatprep.subr.bf16.mxu1 %v3498_v11  ;;  %v3529_v10 = vld [vmem:[#allocation8 + $0x148] sm:$0xff]  }
 0x10d   : > { %v3530_v11 = vld [vmem:[#allocation8 + $0x1c8] sm:$0xff]  }
 0x10f   : > { %3239 = vmatpush3.bf16.msra.mxu0 %v3499_v14  ;;  %3261 = vmatpush3.bf16.msra.mxu1 %v3500_v15  ;;  %v3532_v14 = vld [vmem:[#allocation8 + $0x188] sm:$0xff]   ;;  %v3533_v15 = vld [vmem:[#allocation8 + $0x150] sm:$0xff]  }
 0x110   : > { %3240 = vmatprep.subr.bf16.mxu0 %v3501_v16  ;;  %3262 = vmatprep.subr.bf16.mxu1 %v3502_v17  ;;  %v3534_v16 = vld [vmem:[#allocation8 + $0x1d0] sm:$0xff]  }
 0x111   : > { %v3535_v17 = vld [vmem:[#allocation8 + $0x110] sm:$0xff]  }
 0x113   : > { %3241 = vmatpush3.bf16.msra.mxu0 %v3503_v18  ;;  %3263 = vmatpush3.bf16.msra.mxu1 %v3504_v19  ;;  %v3536_v18 = vld [vmem:[#allocation8 + $0x190] sm:$0xff]   ;;  %v3537_v19 = vld [vmem:[#allocation8 + $0x158] sm:$0xff]  }
 0x114   : > { %3242 = vmatprep.subr.bf16.mxu0 %v3505_v20  ;;  %3264 = vmatprep.subr.bf16.mxu1 %v3506_v21  ;;  %v3538_v20 = vld [vmem:[#allocation8 + $0x1d8] sm:$0xff]  }
 0x115   : > { %v3539_v21 = vld [vmem:[#allocation8 + $0x118] sm:$0xff]  }
 0x117   : > { %3243 = vmatpush3.bf16.msra.mxu0 %v3507_v22  ;;  %3265 = vmatpush3.bf16.msra.mxu1 %v3508_v23  ;;  %v3540_v22 = vld [vmem:[#allocation8 + $0x198] sm:$0xff]   ;;  %v3541_v23 = vld [vmem:[#allocation8 + $0x160] sm:$0xff]  }
 0x118   : > { %3244 = vmatprep.subr.bf16.mxu0 %v3509_v24  ;;  %3266 = vmatprep.subr.bf16.mxu1 %v3510_v25  ;;  %v3542_v24 = vld [vmem:[#allocation8 + $0x1e0] sm:$0xff]  }
 0x119   : > { %v3543_v25 = vld [vmem:[#allocation8 + $0x120] sm:$0xff]  }
 0x11b   : > { %3245 = vmatpush3.bf16.msra.mxu0 %v3511_v26  ;;  %3267 = vmatpush3.bf16.msra.mxu1 %v3512_v27  ;;  %v3544_v26 = vld [vmem:[#allocation8 + $0x1a0] sm:$0xff]   ;;  %v3545_v27 = vld [vmem:[#allocation8 + $0x168] sm:$0xff]  }
 0x11c   : > { %3246 = vmatprep.subr.bf16.mxu0 %v3513_v28  ;;  %3268 = vmatprep.subr.bf16.mxu1 %v3514_v29  ;;  %v3546_v28 = vld [vmem:[#allocation8 + $0x1e8] sm:$0xff]   ;;  %v434_v29 = vsub.s32 4, %v4080_v42 }
 0x11f   : > { %3247 = vmatpush3.bf16.msra.mxu0 %v3515_v30  ;;  %3269 = vmatpush3.bf16.msra.mxu1 %v3516_v31  ;;  %v3547_v30 = vld [vmem:[#allocation8 + $0x128] sm:$0xff]   ;;  %v442_v31 = vsub.s32 6, %v4080_v42 }
 0x120   : > { %3248 = vmatprep.subr.bf16.mxu0 %v3517_v32  ;;  %3270 = vmatprep.subr.bf16.mxu1 %v3518_v33  ;;  %v438_v32 = vsub.s32 5, %v4080_v42  ;;  %v3548_v33 = vld [vmem:[#allocation8 + $0x1a8] sm:$0xff]  }
 0x123   : > { %3249 = vmatpush3.bf16.msra.mxu0 %v3519_v34  ;;  %3271 = vmatpush3.bf16.msra.mxu1 %v3520_v12  ;;  %v446_v34 = vsub.s32 7, %v4080_v42  ;;  %v3549_v12 = vld [vmem:[#allocation8 + $0x170] sm:$0xff]  }
 0x124   : > { %3250 = vmatprep.subr.bf16.mxu0 %v3521_v35  ;;  %3272 = vmatprep.subr.bf16.mxu1 %v3522_v36  ;;  %v3550_v35 = vld [vmem:[#allocation8 + $0x1f0] sm:$0xff]   ;;  %v435_v36 = vrot.slane %v4083_v0, %v434_v29 }
 0x127   : > { %3251 = vmatpush3.bf16.msra.mxu0 %v3523_v37  ;;  %3273 = vmatpush3.bf16.msra.mxu1 %v3524_v38  ;;  %v443_v37 = vrot.slane %v4083_v0, %v442_v31  ;;  %v439_v38 = vrot.slane %v4083_v0, %v438_v32 }
 0x128   : > { %3280 = vmatprep.subr.bf16.mxu0 %v3525_v39  ;;  %3302 = vmatprep.subr.bf16.mxu1 %v3526_v40  ;;  %v3551_v39 = vld [vmem:[#allocation8 + $0x130] sm:$0xff]   ;;  %v447_v40 = vrot.slane %v4083_v0, %v446_v34 }
 0x17d   : > { %v1170_v51 = vpop.f32.mrb[0].mxu0  ;;  %v1211_v53 = vpop.f32.mrb[0].mxu1 }
 0x17e   : > { %v1171_v52 = vadd.f32 %v1170_v51, %v419_v47  ;;  %v1172_v54 = vpop.f32.mrb[1].mxu0  ;;  %v1212_v55 = vadd.f32 %v1211_v53, %v427_v48  ;;  %v1213_v57 = vpop.f32.mrb[1].mxu1  ;;  %v3553_v47 = vld [vmem:[#allocation8 + $0x178] sm:$0xff]  }
 0x17f   : > { %v1173_v56 = vadd.f32 %v1172_v54, %v423_v49  ;;  %v1174_v58 = vpop.f32.mrb[2].mxu0  ;;  %v1214_v60 = vadd.f32 %v1213_v57, %v431_v50  ;;  %v1215_v61 = vpop.f32.mrb[2].mxu1  ;;  %v3554_v49 = vld [vmem:[#allocation8 + $0x1f8] sm:$0xff]  }
 0x180   : > { %v1464_v59 = vmax.f32 %v1171_v52, 0.0  ;;  %v1175_v62 = vpop.f32.mrb[3].mxu0  ;;  %v1466_v63 = vmax.f32 %v1212_v55, 0.0  ;;  %v1216_v2 = vpop.f32.mrb[3].mxu1  ;;  %v3555_v57 = vld [vmem:[#allocation8 + $0x138] sm:$0xff]  }
 0x181   : > { %v1465_v1 = vmax.f32 %v1173_v56, 0.0  ;;  %v1467_v4 = vmax.f32 %v1214_v60, 0.0  ;;  %v3556_v61 = vld [vmem:[#allocation8 + $0x1b8] sm:$0xff]   ;;  %v3557_v62 = vld [vmem:[#allocation8 + $0x240] sm:$0xff]  }
 0x182   : > { %v1480_v3 = vpack.c.bf16 %v1464_v59, %v1464_v59  ;;  %v1482_v5 = vpack.c.bf16 %v1466_v63, %v1466_v63 }
 0x183   : > { %v1481_v6 = vpack.c.bf16 %v1465_v1, %v1465_v1  ;;  %v1483_v8 = vpack.c.bf16 %v1467_v4, %v1467_v4 }
 0x185   : > { %2559 = vmatprep.mubr.bf16.mxu0 %v1481_v6  ;;  %2599 = vmatprep.mubr.bf16.mxu1 %v1483_v8  ;;  %v3559_v8 = vld [vmem:[#allocation8 + $0x200] sm:$0xff]  }
 0x186   : > { %2560 = vmatmul.mubr.bf16.vlgmr.msra.gmra.mrb[16].mxu0 %v1480_v3  ;;  %2600 = vmatmul.mubr.bf16.vlgmr.msra.gmra.mrb[16].mxu1 %v1482_v5  ;;  %v3558_v3 = vld [vmem:[#allocation8 + $0x2c0] sm:$0xff]  }
 0x187   : > { %3281 = vmatpush3.bf16.msra.mxu0 %v3527_v7  ;;  %3303 = vmatpush3.bf16.msra.mxu1 %v3528_v9 }
 0x188   : > { %3282 = vmatprep.subr.bf16.mxu0 %v3529_v10  ;;  %3304 = vmatprep.subr.bf16.mxu1 %v3530_v11  ;;  %v3560_v10 = vld [vmem:[#allocation8 + $0x280] sm:$0xff]   ;;  %v3561_v11 = vld [vmem:[#allocation8 + $0x248] sm:$0xff]  }
 0x18b   : > { %3283 = vmatpush3.bf16.msra.mxu0 %v3531_v13  ;;  %3305 = vmatpush3.bf16.msra.mxu1 %v3532_v14  ;;  %v3562_v13 = vld [vmem:[#allocation8 + $0x2c8] sm:$0xff]  }
 0x18c   : > { %3284 = vmatprep.subr.bf16.mxu0 %v3533_v15  ;;  %3306 = vmatprep.subr.bf16.mxu1 %v3534_v16  ;;  %v3563_v14 = vld [vmem:[#allocation8 + $0x208] sm:$0xff]   ;;  %v3565_v16 = vld [vmem:[#allocation8 + $0x250] sm:$0xff]  }
 0x18d   : > { %v3564_v15 = vld [vmem:[#allocation8 + $0x288] sm:$0xff]  }
 0x18f   : > { %3285 = vmatpush3.bf16.msra.mxu0 %v3535_v17  ;;  %3307 = vmatpush3.bf16.msra.mxu1 %v3536_v18  ;;  %v3566_v17 = vld [vmem:[#allocation8 + $0x2d0] sm:$0xff]  }
 0x190   : > { %3286 = vmatprep.subr.bf16.mxu0 %v3537_v19  ;;  %3308 = vmatprep.subr.bf16.mxu1 %v3538_v20  ;;  %v3567_v18 = vld [vmem:[#allocation8 + $0x210] sm:$0xff]   ;;  %v3569_v20 = vld [vmem:[#allocation8 + $0x258] sm:$0xff]  }
 0x191   : > { %v3568_v19 = vld [vmem:[#allocation8 + $0x290] sm:$0xff]  }
 0x193   : > { %3287 = vmatpush3.bf16.msra.mxu0 %v3539_v21  ;;  %3309 = vmatpush3.bf16.msra.mxu1 %v3540_v22  ;;  %v3570_v21 = vld [vmem:[#allocation8 + $0x2d8] sm:$0xff]  }
 0x194   : > { %3288 = vmatprep.subr.bf16.mxu0 %v3541_v23  ;;  %3310 = vmatprep.subr.bf16.mxu1 %v3542_v24  ;;  %v3571_v22 = vld [vmem:[#allocation8 + $0x218] sm:$0xff]   ;;  %v3573_v24 = vld [vmem:[#allocation8 + $0x260] sm:$0xff]  }
 0x195   : > { %v3572_v23 = vld [vmem:[#allocation8 + $0x298] sm:$0xff]  }
 0x197   : > { %3289 = vmatpush3.bf16.msra.mxu0 %v3543_v25  ;;  %3311 = vmatpush3.bf16.msra.mxu1 %v3544_v26  ;;  %v3574_v25 = vld [vmem:[#allocation8 + $0x2e0] sm:$0xff]  }
 0x198   : > { %3290 = vmatprep.subr.bf16.mxu0 %v3545_v27  ;;  %3312 = vmatprep.subr.bf16.mxu1 %v3546_v28  ;;  %v3575_v26 = vld [vmem:[#allocation8 + $0x220] sm:$0xff]   ;;  %v3577_v28 = vld [vmem:[#allocation8 + $0x268] sm:$0xff]  }
 0x199   : > { %v3576_v27 = vld [vmem:[#allocation8 + $0x2a0] sm:$0xff]  }
 0x19b   : > { %3291 = vmatpush3.bf16.msra.mxu0 %v3547_v30  ;;  %3313 = vmatpush3.bf16.msra.mxu1 %v3548_v33  ;;  %v3578_v30 = vld [vmem:[#allocation8 + $0x2e8] sm:$0xff]  }
 0x19c   : > { %3292 = vmatprep.subr.bf16.mxu0 %v3549_v12  ;;  %3314 = vmatprep.subr.bf16.mxu1 %v3550_v35  ;;  %v3579_v33 = vld [vmem:[#allocation8 + $0x228] sm:$0xff]   ;;  %v4116_v12 = vld [vmem:[#allocation7 + $0x8] sm:$0xff] }
 0x19d   : > { %v1252_v48 = vpop.f32.mrb[4].mxu0  ;;  %v1293_v51 = vpop.f32.mrb[4].mxu1  ;;  %v3580_v35 = vld [vmem:[#allocation8 + $0x2a8] sm:$0xff]  }
 0x19e   : > { %v1253_v50 = vadd.f32 %v1252_v48, %v435_v36  ;;  %v1254_v52 = vpop.f32.mrb[5].mxu0  ;;  %v1294_v53 = vadd.f32 %v1293_v51, %v443_v37  ;;  %v1295_v55 = vpop.f32.mrb[5].mxu1  ;;  %v3581_v36 = vld [vmem:[#allocation8 + $0x270] sm:$0xff]  }
 0x19f   : > { %v1255_v54 = vadd.f32 %v1254_v52, %v439_v38  ;;  %v1256_v56 = vpop.f32.mrb[6].mxu0  ;;  %3293 = vmatpush3.bf16.msra.mxu0 %v3551_v39  ;;  %v1296_v59 = vadd.f32 %v1295_v55, %v447_v40  ;;  %v1297_v60 = vpop.f32.mrb[6].mxu1  ;;  %3315 = vmatpush3.bf16.msra.mxu1 %v3552_v41  ;;  %v3582_v37 = vld [vmem:[#allocation8 + $0x2f0] sm:$0xff]   ;;  %v451_v38 = vrot.slane %v4116_v12, %v418_v43  ;;  %v3586_v43 = vld [vmem:[#allocation8 + $0x2f8] sm:$0xff]  }
 0x1a0   : > { %v1468_v58 = vmax.f32 %v1253_v50, 0.0  ;;  %v1257_v0 = vpop.f32.mrb[7].mxu0  ;;  %3294 = vmatprep.subr.bf16.mxu0 %v3553_v47  ;;  %v1470_v63 = vmax.f32 %v1294_v53, 0.0  ;;  %v1298_v2 = vpop.f32.mrb[7].mxu1  ;;  %3316 = vmatprep.subr.bf16.mxu1 %v3554_v49  ;;  %v459_v39 = vrot.slane %v4116_v12, %v426_v44  ;;  %v455_v40 = vrot.slane %v4116_v12, %v422_v45  ;;  %v3583_v41 = vld [vmem:[#allocation8 + $0x230] sm:$0xff]   ;;  %v3585_v49 = vld [vmem:[#allocation8 + $0x278] sm:$0xff]  }
 0x1a1   : > { %v1469_v1 = vmax.f32 %v1255_v54, 0.0  ;;  %v1471_v5 = vmax.f32 %v1296_v59, 0.0  ;;  %v463_v47 = vrot.slane %v4116_v12, %v430_v46  ;;  %v3584_v48 = vld [vmem:[#allocation8 + $0x2b0] sm:$0xff]   ;;  %v3587_v45 = vld [vmem:[#allocation8 + $0x238] sm:$0xff]   ;;  %v3589_v0 = vld [vmem:[#allocation8 + $0x340] sm:$0xff]  }
 0x1a2   : > { %v1484_v4 = vpack.c.bf16 %v1468_v58, %v1468_v58  ;;  %v1486_v6 = vpack.c.bf16 %v1470_v63, %v1470_v63  ;;  %v3588_v60 = vld [vmem:[#allocation8 + $0x2b8] sm:$0xff]  }
 0x1a3   : > { %v1485_v7 = vpack.c.bf16 %v1469_v1, %v1469_v1  ;;  %3295 = vmatpush3.bf16.msra.mxu0 %v3555_v57  ;;  %v1487_v9 = vpack.c.bf16 %v1471_v5, %v1471_v5  ;;  %3317 = vmatpush3.bf16.msra.mxu1 %v3556_v61  ;;  %v3590_v1 = vld [vmem:[#allocation8 + $0x3c0] sm:$0xff]  }
 0x1a4   : > { %3324 = vmatprep.subr.bf16.mxu0 %v3557_v62  ;;  %3346 = vmatprep.subr.bf16.mxu1 %v3558_v3 }
 0x1a5   : > { %2639 = vmatprep.mubr.bf16.mxu0 %v1485_v7  ;;  %2679 = vmatprep.mubr.bf16.mxu1 %v1487_v9  ;;  %v3593_v9 = vld [vmem:[#allocation8 + $0x348] sm:$0xff]  }
 0x1a6   : > { %2640 = vmatmul.mubr.bf16.vlgmr.msra.gmra.mrb[20].mxu0 %v1484_v4  ;;  %2680 = vmatmul.mubr.bf16.vlgmr.msra.gmra.mrb[20].mxu1 %v1486_v6  ;;  %v3591_v6 = vld [vmem:[#allocation8 + $0x300] sm:$0xff]  }
 0x1a7   : > { %3325 = vmatpush3.bf16.msra.mxu0 %v3559_v8  ;;  %3347 = vmatpush3.bf16.msra.mxu1 %v3560_v10  ;;  %v3592_v8 = vld [vmem:[#allocation8 + $0x380] sm:$0xff]   ;;  %v3594_v10 = vld [vmem:[#allocation8 + $0x3c8] sm:$0xff]  }
 0x1a8   : > { %3326 = vmatprep.subr.bf16.mxu0 %v3561_v11  ;;  %3348 = vmatprep.subr.bf16.mxu1 %v3562_v13  ;;  %v3595_v11 = vld [vmem:[#allocation8 + $0x308] sm:$0xff]  }
 0x1a9   : > { %v3596_v13 = vld [vmem:[#allocation8 + $0x388] sm:$0xff]  }
 0x1ab   : > { %3327 = vmatpush3.bf16.msra.mxu0 %v3563_v14  ;;  %3349 = vmatpush3.bf16.msra.mxu1 %v3564_v15  ;;  %v3597_v14 = vld [vmem:[#allocation8 + $0x350] sm:$0xff]  }
 0x1ac   : > { %3328 = vmatprep.subr.bf16.mxu0 %v3565_v16  ;;  %3350 = vmatprep.subr.bf16.mxu1 %v3566_v17  ;;  %v3598_v15 = vld [vmem:[#allocation8 + $0x3d0] sm:$0xff]  }
 0x1ad   : > { %v3599_v16 = vld [vmem:[#allocation8 + $0x310] sm:$0xff]  }
 0x1ae   : > { %v3600_v17 = vld [vmem:[#allocation8 + $0x390] sm:$0xff]  }
 0x1af   : > { %3329 = vmatpush3.bf16.msra.mxu0 %v3567_v18  ;;  %3351 = vmatpush3.bf16.msra.mxu1 %v3568_v19  ;;  %v3601_v18 = vld [vmem:[#allocation8 + $0x358] sm:$0xff]  }
 0x1b0   : > { %3330 = vmatprep.subr.bf16.mxu0 %v3569_v20  ;;  %3352 = vmatprep.subr.bf16.mxu1 %v3570_v21  ;;  %v3602_v19 = vld [vmem:[#allocation8 + $0x3d8] sm:$0xff]  }
 0x1b1   : > { %v3603_v20 = vld [vmem:[#allocation8 + $0x318] sm:$0xff]  }
 0x1b2   : > { %v3604_v21 = vld [vmem:[#allocation8 + $0x398] sm:$0xff]  }
 0x1b3   : > { %3331 = vmatpush3.bf16.msra.mxu0 %v3571_v22  ;;  %3353 = vmatpush3.bf16.msra.mxu1 %v3572_v23  ;;  %v3605_v22 = vld [vmem:[#allocation8 + $0x360] sm:$0xff]  }
 0x1b4   : > { %3332 = vmatprep.subr.bf16.mxu0 %v3573_v24  ;;  %3354 = vmatprep.subr.bf16.mxu1 %v3574_v25  ;;  %v3606_v23 = vld [vmem:[#allocation8 + $0x3e0] sm:$0xff]  }
 0x1b5   : > { %v3607_v24 = vld [vmem:[#allocation8 + $0x320] sm:$0xff]  }
 0x1b6   : > { %v3608_v25 = vld [vmem:[#allocation8 + $0x3a0] sm:$0xff]  }
 0x1b7   : > { %3333 = vmatpush3.bf16.msra.mxu0 %v3575_v26  ;;  %3355 = vmatpush3.bf16.msra.mxu1 %v3576_v27  ;;  %v3609_v26 = vld [vmem:[#allocation8 + $0x368] sm:$0xff]  }
 0x1b8   : > { %3334 = vmatprep.subr.bf16.mxu0 %v3577_v28  ;;  %3356 = vmatprep.subr.bf16.mxu1 %v3578_v30  ;;  %v3610_v27 = vld [vmem:[#allocation8 + $0x3e8] sm:$0xff]  }
 0x1b9   : > { %v3611_v28 = vld [vmem:[#allocation8 + $0x328] sm:$0xff]  }
 0x1ba   : > { %v3612_v30 = vld [vmem:[#allocation8 + $0x3a8] sm:$0xff]  }
 0x1bb   : > { %3335 = vmatpush3.bf16.msra.mxu0 %v3579_v33  ;;  %3357 = vmatpush3.bf16.msra.mxu1 %v3580_v35  ;;  %v3613_v33 = vld [vmem:[#allocation8 + $0x370] sm:$0xff]  }
 0x1bc   : > { %3336 = vmatprep.subr.bf16.mxu0 %v3581_v36  ;;  %3358 = vmatprep.subr.bf16.mxu1 %v3582_v37  ;;  %v3614_v35 = vld [vmem:[#allocation8 + $0x3f0] sm:$0xff]   ;;  %v467_v36 = vrot.slane %v4116_v12, %v434_v29  ;;  %v475_v37 = vrot.slane %v4116_v12, %v442_v31  ;;  %v3618_v29 = vld [vmem:[#allocation8 + $0x3f8] sm:$0xff]  }
 0x1bd   : > { %v1334_v50 = vpop.f32.mrb[8].mxu0  ;;  %v1375_v52 = vpop.f32.mrb[8].mxu1 }
 0x1be   : > { %v1335_v51 = vadd.f32 %v1334_v50, %v451_v38  ;;  %v1336_v53 = vpop.f32.mrb[9].mxu0  ;;  %v1376_v44 = vadd.f32 %v1375_v52, %v459_v39  ;;  %v1377_v55 = vpop.f32.mrb[9].mxu1  ;;  %v471_v38 = vrot.slane %v4116_v12, %v438_v32  ;;  %v3615_v39 = vld [vmem:[#allocation8 + $0x330] sm:$0xff]   ;;  %v3619_v32 = vld [vmem:[#allocation8 + $0x338] sm:$0xff]  }
 0x1bf   : > { %v1337_v54 = vadd.f32 %v1336_v53, %v455_v40  ;;  %v1338_v56 = vpop.f32.mrb[10].mxu0  ;;  %3337 = vmatpush3.bf16.msra.mxu0 %v3583_v41  ;;  %v1378_v58 = vadd.f32 %v1377_v55, %v463_v47  ;;  %v1379_v59 = vpop.f32.mrb[10].mxu1  ;;  %3359 = vmatpush3.bf16.msra.mxu1 %v3584_v48  ;;  %v479_v40 = vrot.slane %v4116_v12, %v446_v34  ;;  %v3616_v41 = vld [vmem:[#allocation8 + $0x3b0] sm:$0xff]   ;;  %v3617_v47 = vld [vmem:[#allocation8 + $0x378] sm:$0xff]  }
 0x1c0   : > { %v1472_v57 = vmax.f32 %v1335_v51, 0.0  ;;  %v1339_v46 = vpop.f32.mrb[11].mxu0  ;;  %3338 = vmatprep.subr.bf16.mxu0 %v3585_v49  ;;  %v1474_v61 = vmax.f32 %v1376_v44, 0.0  ;;  %v1380_v63 = vpop.f32.mrb[11].mxu1  ;;  %3360 = vmatprep.subr.bf16.mxu1 %v3586_v43  ;;  %v3620_v12 = vld [vmem:[#allocation8 + $0x3b8] sm:$0xff]  }
 0x1c1   : > { %v1473_v62 = vmax.f32 %v1337_v54, 0.0  ;;  %v1475_v3 = vmax.f32 %v1378_v58, 0.0 }
 0x1c2   : > { %v1488_v2 = vpack.c.bf16 %v1472_v57, %v1472_v57  ;;  %v1490_v4 = vpack.c.bf16 %v1474_v61, %v1474_v61 }
 0x1c3   : > { %v1489_v5 = vpack.c.bf16 %v1473_v62, %v1473_v62  ;;  %3339 = vmatpush3.bf16.msra.mxu0 %v3587_v45  ;;  %v1491_v7 = vpack.c.bf16 %v1475_v3, %v1475_v3  ;;  %3361 = vmatpush3.bf16.msra.mxu1 %v3588_v60  ;;  %v3103_v62 = vld [vmem:[%s4198_s4] ss:$0 sm:$0xff] }
 0x1c4   : > { %3368 = vmatprep.subr.bf16.mxu0 %v3589_v0  ;;  %3390 = vmatprep.subr.bf16.mxu1 %v3590_v1 }
 0x1c5   : > { %2719 = vmatprep.mubr.bf16.mxu0 %v1489_v5  ;;  %2759 = vmatprep.mubr.bf16.mxu1 %v1491_v7 }
 0x1c6   : > { %2720 = vmatmul.mubr.bf16.vlgmr.msra.gmra.mrb[24].mxu0 %v1488_v2  ;;  %2760 = vmatmul.mubr.bf16.vlgmr.msra.gmra.mrb[24].mxu1 %v1490_v4 }
 0x1c7   : > { %3369 = vmatpush3.bf16.msra.mxu0 %v3591_v6  ;;  %3391 = vmatpush3.bf16.msra.mxu1 %v3592_v8 }
 0x1c8   : > { %3370 = vmatprep.subr.bf16.mxu0 %v3593_v9  ;;  %3392 = vmatprep.subr.bf16.mxu1 %v3594_v10 }
 0x1cb   : > { %3371 = vmatpush3.bf16.msra.mxu0 %v3595_v11  ;;  %3393 = vmatpush3.bf16.msra.mxu1 %v3596_v13 }
 0x1cc   : > { %3372 = vmatprep.subr.bf16.mxu0 %v3597_v14  ;;  %3394 = vmatprep.subr.bf16.mxu1 %v3598_v15 }
 0x1cf   : > { %3373 = vmatpush3.bf16.msra.mxu0 %v3599_v16  ;;  %3395 = vmatpush3.bf16.msra.mxu1 %v3600_v17 }
 0x1d0   : > { %3374 = vmatprep.subr.bf16.mxu0 %v3601_v18  ;;  %3396 = vmatprep.subr.bf16.mxu1 %v3602_v19 }
 0x1d3   : > { %3375 = vmatpush3.bf16.msra.mxu0 %v3603_v20  ;;  %3397 = vmatpush3.bf16.msra.mxu1 %v3604_v21 }
 0x1d4   : > { %3376 = vmatprep.subr.bf16.mxu0 %v3605_v22  ;;  %3398 = vmatprep.subr.bf16.mxu1 %v3606_v23 }
 0x1d7   : > { %3377 = vmatpush3.bf16.msra.mxu0 %v3607_v24  ;;  %3399 = vmatpush3.bf16.msra.mxu1 %v3608_v25 }
 0x1d8   : > { %3378 = vmatprep.subr.bf16.mxu0 %v3609_v26  ;;  %3400 = vmatprep.subr.bf16.mxu1 %v3610_v27 }
 0x1db   : > { %3379 = vmatpush3.bf16.msra.mxu0 %v3611_v28  ;;  %3401 = vmatpush3.bf16.msra.mxu1 %v3612_v30 }
 0x1dc   : > { %3380 = vmatprep.subr.bf16.mxu0 %v3613_v33  ;;  %3402 = vmatprep.subr.bf16.mxu1 %v3614_v35 }
 0x1dd   : > { %v1416_v48 = vpop.f32.mrb[12].mxu0  ;;  %v1457_v50 = vpop.f32.mrb[12].mxu1 }
 0x1de   : > { %v1417_v49 = vadd.f32 %v1416_v48, %v467_v36  ;;  %v1418_v43 = vpop.f32.mrb[13].mxu0  ;;  %v1458_v31 = vadd.f32 %v1457_v50, %v475_v37  ;;  %v1459_v52 = vpop.f32.mrb[13].mxu1 }
 0x1df   : > { %v1419_v51 = vadd.f32 %v1418_v43, %v471_v38  ;;  %v1420_v53 = vpop.f32.mrb[14].mxu0  ;;  %3381 = vmatpush3.bf16.msra.mxu0 %v3615_v39  ;;  %v1460_v54 = vadd.f32 %v1459_v52, %v479_v40  ;;  %v1461_v42 = vpop.f32.mrb[14].mxu1  ;;  %3403 = vmatpush3.bf16.msra.mxu1 %v3616_v41 }
 0x1e0   : > { %v1476_v44 = vmax.f32 %v1417_v49, 0.0  ;;  %v1421_v34 = vpop.f32.mrb[15].mxu0  ;;  %3382 = vmatprep.subr.bf16.mxu0 %v3617_v47  ;;  %v1478_v55 = vmax.f32 %v1458_v31, 0.0  ;;  %v1462_v45 = vpop.f32.mrb[15].mxu1  ;;  %3404 = vmatprep.subr.bf16.mxu1 %v3618_v29 }
 0x1e1   : > { %v1477_v56 = vmax.f32 %v1419_v51, 0.0  ;;  %v1479_v57 = vmax.f32 %v1460_v54, 0.0 }
 0x1e2   : > { %v1494_v58 = vpack.c.bf16 %v1478_v55, %v1478_v55  ;;  %v1492_v46 = vpack.c.bf16 %v1476_v44, %v1476_v44 }
 0x1e3   : > { %v1493_v59 = vpack.c.bf16 %v1477_v56, %v1477_v56  ;;  %3383 = vmatpush3.bf16.msra.mxu0 %v3619_v32  ;;  %v1495_v60 = vpack.c.bf16 %v1479_v57, %v1479_v57  ;;  %3405 = vmatpush3.bf16.msra.mxu1 %v3620_v12 }
 0x1e5   : > { %2799 = vmatprep.mubr.bf16.mxu0 %v1493_v59  ;;  %2839 = vmatprep.mubr.bf16.mxu1 %v1495_v60 }
 0x1e6   : > { %2800 = vmatmul.mubr.bf16.vlgmr.msra.gmra.mrb[28].mxu0 %v1492_v46  ;;  %2840 = vmatmul.mubr.bf16.vlgmr.msra.gmra.mrb[28].mxu1 %v1494_v58 }
 0x259   : > { %v3252_v0 = vpop.f32.mrb[16].mxu0  ;;  %v3274_v61 = vpop.f32.mrb[16].mxu1 }
 0x25a   : > { %v3253_v63 = vpop.f32.mrb[17].mxu0  ;;  %v3275_v2 = vpop.f32.mrb[17].mxu1 }
 0x25b   : > { %v3254_v1 = vadd.f32 %v3253_v63, %v3252_v0  ;;  %v3255_v3 = vpop.f32.mrb[18].mxu0  ;;  %v3276_v4 = vadd.f32 %v3275_v2, %v3274_v61  ;;  %v3277_v5 = vpop.f32.mrb[18].mxu1 }
 0x25c   : > { %v3256_v6 = vpop.f32.mrb[19].mxu0  ;;  %v3278_v8 = vpop.f32.mrb[19].mxu1 }
 0x25d   : > { %v2562_v7 = vadd.f32 %v3254_v1, %v3103_v62 }
 0x25f   : > { %v2602_v9 = vadd.f32 %v3276_v4, %v2562_v7 }
 0x279   : > { %v3296_v10 = vpop.f32.mrb[20].mxu0  ;;  %v3318_v11 = vpop.f32.mrb[20].mxu1 }
 0x27a   : > { %v3297_v13 = vpop.f32.mrb[21].mxu0  ;;  %v3319_v15 = vpop.f32.mrb[21].mxu1 }
 0x27b   : > { %v3298_v14 = vadd.f32 %v3297_v13, %v3296_v10  ;;  %v3299_v16 = vpop.f32.mrb[22].mxu0  ;;  %v3320_v17 = vadd.f32 %v3319_v15, %v3318_v11  ;;  %v3321_v18 = vpop.f32.mrb[22].mxu1 }
 0x27c   : > { %v3300_v19 = vpop.f32.mrb[23].mxu0  ;;  %v3322_v21 = vpop.f32.mrb[23].mxu1 }
 0x27d   : > { %v2642_v20 = vadd.f32 %v3298_v14, %v2602_v9 }
 0x27f   : > { %v2682_v22 = vadd.f32 %v3320_v17, %v2642_v20 }
 0x299   : > { %v3340_v23 = vpop.f32.mrb[24].mxu0  ;;  %v3362_v24 = vpop.f32.mrb[24].mxu1 }
 0x29a   : > { %v3341_v25 = vpop.f32.mrb[25].mxu0  ;;  %v3363_v27 = vpop.f32.mrb[25].mxu1 }
 0x29b   : > { %v3342_v26 = vadd.f32 %v3341_v25, %v3340_v23  ;;  %v3343_v28 = vpop.f32.mrb[26].mxu0  ;;  %v3364_v30 = vadd.f32 %v3363_v27, %v3362_v24  ;;  %v3365_v33 = vpop.f32.mrb[26].mxu1 }
 0x29c   : > { %v3344_v35 = vpop.f32.mrb[27].mxu0  ;;  %v3366_v37 = vpop.f32.mrb[27].mxu1 }
 0x29d   : > { %v2722_v36 = vadd.f32 %v3342_v26, %v2682_v22 }
 0x29f   : > { %v2762_v38 = vadd.f32 %v3364_v30, %v2722_v36 }
 0x2b9   : > { %v3384_v39 = vpop.f32.mrb[28].mxu0  ;;  %v3406_v40 = vpop.f32.mrb[28].mxu1 }
 0x2ba   : > { %v3385_v41 = vpop.f32.mrb[29].mxu0  ;;  %v3407_v48 = vpop.f32.mrb[29].mxu1 }
 0x2bb   : > { %v3386_v47 = vadd.f32 %v3385_v41, %v3384_v39  ;;  %v3387_v29 = vpop.f32.mrb[30].mxu0  ;;  %v3408_v49 = vadd.f32 %v3407_v48, %v3406_v40  ;;  %v3409_v50 = vpop.f32.mrb[30].mxu1 }
 0x2bc   : > { %v3388_v43 = vpop.f32.mrb[31].mxu0  ;;  %v3410_v51 = vpop.f32.mrb[31].mxu1 }
 0x2bd   : > { %v2802_v31 = vadd.f32 %v3386_v47, %v2762_v38 }
 0x2bf   : > { %v2842_v52 = vadd.f32 %v3408_v49, %v2802_v31 }
 0x2c1   : > { %2847 = vst [vmem:[%s281_s15] sm:$0xff] %v2842_v52 }
 0x2c2   : > { %3749 = shalt.err (!%p3746_p4)
}
 0x2c3   : > { %s3750_s16 = scalar_lea.hbm %s4150_s7, 128  ;;  %s3754_s24 = scalar_lea.hbm %s4199_s5, 256 }
 0x2c4   : > { %p3751_p0 = scmp.ne.s32.totalorder %s4150_s7, %s3750_s16  ;;  %p3755_p8 = scmp.lt.u32.totalorder %s4150_s7, %s4199_s5 }
 0x2c5   : > { %p3756_p13 = scmp.lt.u32.totalorder %s3754_s24, %s3750_s16  ;;  %p3758_p10 = scmp.lt.u32.totalorder %s3750_s16, %s4150_s7 }
 0x2c6   : > { %p3752_p9 = pnand %p3751_p0, %p3998_p3 }
 0x2c7   : > { %p3757_p6 = por %p3756_p13, %p3755_p8 }
 0x2c8   : > { %p3753_p11 = pneg %p3752_p9 }
 0x2c9   : > { %p3759_p5 = por %p3758_p10, %p3757_p6 }
 0x2cb   : > { %p3760_p7 = pnand %p3759_p5, %p3753_p11 }
 0x2cd   : > { %3763 = shalt.err (!%p3760_p7)
}
 0x2ce   : > { %3426 = dma.vmem_to_hbm [thread:$0]  (%p3998_p3), %s4152_s6, 128, %s4150_s7, %s2849_s27  }
 0x2cf PF: > { %s2874_s13 = sand.u32 1, %s3798_s18   ;;  %p4217_p12 = scmp.ne.s32.totalorder %s4204_s25, 0 }
 0x2d0   : > { %p4218_p1 = scmp.ge.s32.totalorder %s3810_s21, 2  ;;  %s2875_s15 = scalar_lea.sflag [#allocation4], %s2874_s13 }
 0x2d2   : > { %p3443_p2 = pnand %p4218_p1, %p4217_p12 }
 0x2d4   : > { %3793 = dma.done.wait (!%p3443_p2), %s2875_s15, 128  }
 0x2d5   : > { %3795 = vsyncadd (!%p3443_p2), %s2875_s15, 4294967168  ;;  %p20_p4 = scmp.ge.s32.totalorder %s3985_s14, 4   ;;  %s4219_s18 = smov %s3802_s19 }
 0x2d6   : > { %s4220_s19 = smov %s3806_s20  ;;  %s4221_s20 = smov %s3994_s23 }
 0x2d7   : > { %s4222_s21 = smov %s3985_s14  ;;  %22 = sbr.rel (!%p20_p4) target bundleno = 7 (0x7), region = 97 }
 0x2de   :  { %2880 = vsyncpa [#allocation3], 1 }
 0x2df   :  { %2882 = vsyncpa [#allocation3 + $0x1], 1 }
 0x2e0   :  { %2883 = vsyncpa [#allocation6], 1 }
 0x2e1   :  { %2884 = vsyncpa [#allocation9], 1 }
 0x2e2   :  { %2885 = vsyncpa [#allocation4], 1 }
 0x2e3   :  { %2887 = vsyncpa [#allocation4 + $0x1], 1 }

</bundles_post_ra>
